<compile_context>
chip_gen: v5e
topology: v5e:2x2
jax: 0.10.0
libtpu: 0.0.40
codegen_flags: <defaults>
</compile_context>

<pallas_src>
import functools

import numpy as np
import jax
import jax.numpy as jnp
from jax.experimental import pallas as pl
from jax.experimental.pallas import tpu as pltpu

# Hyper-parameters of the PyTorch module (static).
THRESH = 0.5       # base / lambda
EPSILON = 0.1      # miner epsilon
SCALE_POS = 2.0    # alpha
SCALE_NEG = 50.0   # beta


def _masked_add_one_lse(vals, mask, scale):
    """Row-wise (1/scale) * logsumexp([0, vals[mask]...]); 0 for rows with empty mask."""
    neg_inf = jnp.float32(-jnp.inf)
    masked = jnp.where(mask, vals, neg_inf)
    m = jnp.maximum(jnp.max(masked, axis=1, keepdims=True), 0.0)          # finite, >= 0
    s = jnp.sum(jnp.where(mask, jnp.exp(masked - m), 0.0), axis=1, keepdims=True)
    lse = m + jnp.log(s + jnp.exp(-m))
    any_kept = jnp.sum(mask.astype(jnp.float32), axis=1, keepdims=True) > 0.0
    return jnp.where(any_kept, lse / scale, 0.0)


def _ms_loss_kernel(emb_ref, lbl_row_ref, lbl_col_ref, out_ref, *,
                    alpha, beta, base, epsilon):
    x = emb_ref[...]                                            # (Np, Dp) f32, D zero-padded

    # Row L2 normalization (CosineSimilarity). Padded zero rows stay zero.
    norm_sq = jnp.sum(x * x, axis=1, keepdims=True)
    e = x * jax.lax.rsqrt(jnp.maximum(norm_sq, jnp.float32(1e-24)))

    # Cosine similarity matrix on the MXU; contract last dims of both operands
    # (avoids an explicit transpose of the (Np, Dp) tile).
    mat = jax.lax.dot_general(
        e, e, dimension_numbers=(((1,), (1,)), ((), ())),
        preferred_element_type=jnp.float32)                     # (Np, Np)

    lr = lbl_row_ref[...]                                       # (1, Np) int32, -1 = padded
    lc = lbl_col_ref[...]                                       # (Np, 1) int32
    same = lc == lr
    valid = (lc >= 0) & (lr >= 0)                               # both endpoints are real rows
    rid = jax.lax.broadcasted_iota(jnp.int32, mat.shape, 0)
    cid = jax.lax.broadcasted_iota(jnp.int32, mat.shape, 1)
    off_diag = rid != cid                                       # exclude self-pairs

    pos_mask = same & off_diag & valid                          # all positive pairs
    neg_mask = (~same) & valid                                  # all negative pairs

    neg_inf = jnp.float32(-jnp.inf)
    pos_inf = jnp.float32(jnp.inf)
    hardest_neg = jnp.max(jnp.where(neg_mask, mat, neg_inf), axis=1, keepdims=True)
    hardest_pos = jnp.min(jnp.where(pos_mask, mat, pos_inf), axis=1, keepdims=True)

    # MultiSimilarityMiner: keep only informative ("hard") pairs.
    hard_pos = pos_mask & ((mat - epsilon) < hardest_neg)
    hard_neg = neg_mask & ((mat + epsilon) > hardest_pos)

    # MultiSimilarityLoss per-anchor terms (add_one logsumexp, zero if no kept pairs).
    pos_loss = _masked_add_one_lse(alpha * (base - mat), hard_pos, alpha)   # (Np, 1)
    neg_loss = _masked_add_one_lse(beta * (mat - base), hard_neg, beta)     # (Np, 1)
    row_loss = pos_loss + neg_loss

    # AvgNonZeroReducer: mean over rows with loss > 0 (padded rows are exactly 0).
    nonzero = row_loss > 0.0
    total = jnp.sum(jnp.where(nonzero, row_loss, 0.0))
    count = jnp.sum(nonzero.astype(jnp.float32))
    out_ref[0, 0] = jnp.where(count > 0.0, total / jnp.maximum(count, 1.0), 0.0)


def multi_similarity_loss_pallas(embeddings, labels,
                                 thresh=THRESH, epsilon=EPSILON,
                                 scale_pos=SCALE_POS, scale_neg=SCALE_NEG):
    embeddings = jnp.asarray(embeddings, jnp.float32)
    labels = jnp.asarray(labels, jnp.int32)
    n, d = embeddings.shape

    # Pad to native TPU tile shapes: lane axis (D) -> x128, sublane axis (N) -> x8.
    d_pad = max(128, ((d + 127) // 128) * 128)
    n_pad = max(8, ((n + 7) // 8) * 8)

    emb_p = jnp.zeros((n_pad, d_pad), jnp.float32).at[:n, :d].set(embeddings)
    lbl_p = jnp.full((n_pad,), -1, jnp.int32).at[:n].set(labels)   # -1 marks padded rows
    lbl_row = lbl_p.reshape(1, n_pad)
    lbl_col = lbl_p.reshape(n_pad, 1)

    kernel = functools.partial(
        _ms_loss_kernel,
        alpha=float(scale_pos), beta=float(scale_neg),
        base=float(thresh), epsilon=float(epsilon))

    out = pl.pallas_call(
        kernel,
        out_shape=jax.ShapeDtypeStruct((1, 1), jnp.float32),
        in_specs=[
            pl.BlockSpec((n_pad, d_pad), lambda: (0, 0)),
            pl.BlockSpec((1, n_pad), lambda: (0, 0)),
            pl.BlockSpec((n_pad, 1), lambda: (0, 0)),
        ],
        out_specs=pl.BlockSpec(memory_space=pltpu.SMEM),
    )(emb_p, lbl_row, lbl_col)
    return out[0, 0]


def _reference_loss(embeddings, labels, thresh=THRESH, epsilon=EPSILON,
                    scale_pos=SCALE_POS, scale_neg=SCALE_NEG):
    """Plain-JAX reference of the same MS-miner + MS-loss math (sanity check)."""
    x = jnp.asarray(embeddings, jnp.float32)
    lbl = jnp.asarray(labels, jnp.int32)
    e = x / jnp.maximum(jnp.linalg.norm(x, axis=1, keepdims=True), 1e-12)
    mat = e @ e.T
    n = mat.shape[0]
    same = lbl[:, None] == lbl[None, :]
    off_diag = ~jnp.eye(n, dtype=bool)
    pos_mask = same & off_diag
    neg_mask = ~same
    hardest_neg = jnp.max(jnp.where(neg_mask, mat, -jnp.inf), axis=1, keepdims=True)
    hardest_pos = jnp.min(jnp.where(pos_mask, mat, jnp.inf), axis=1, keepdims=True)
    hard_pos = pos_mask & ((mat - epsilon) < hardest_neg)
    hard_neg = neg_mask & ((mat + epsilon) > hardest_pos)

    def add_one_lse(vals, mask, scale):
        masked = jnp.where(mask, vals, -jnp.inf)
        m = jnp.maximum(jnp.max(masked, axis=1, keepdims=True), 0.0)
        s = jnp.sum(jnp.where(mask, jnp.exp(masked - m), 0.0), axis=1, keepdims=True)
        lse = m + jnp.log(s + jnp.exp(-m))
        return jnp.where(jnp.any(mask, axis=1, keepdims=True), lse / scale, 0.0)

    pos_loss = add_one_lse(scale_pos * (thresh - mat), hard_pos, scale_pos)
    neg_loss = add_one_lse(scale_neg * (mat - thresh), hard_neg, scale_neg)
    row_loss = (pos_loss + neg_loss)[:, 0]
    nz = row_loss > 0.0
    cnt = jnp.sum(nz.astype(jnp.float32))
    return jnp.where(cnt > 0.0,
                     jnp.sum(jnp.where(nz, row_loss, 0.0)) / jnp.maximum(cnt, 1.0),
                     0.0)


if __name__ == "__main__":
    key = jax.random.PRNGKey(0)
    n, d, n_classes = 60, 32, 6              # small, N not a multiple of 8 -> exercises padding
    k_emb, k_lbl = jax.random.split(key)
    embeddings = jax.random.normal(k_emb, (n, d), dtype=jnp.float32)
    labels = jax.random.randint(k_lbl, (n,), 0, n_classes, dtype=jnp.int32)

    loss = multi_similarity_loss_pallas(embeddings, labels)
    loss = jax.block_until_ready(loss)

    ref = jax.block_until_ready(_reference_loss(embeddings, labels))
    np.testing.assert_allclose(np.asarray(loss), np.asarray(ref), rtol=1e-4, atol=1e-4)

    print("KERNEL_OK")
</pallas_src>

<mosaic_0001>
module attributes {stable_mosaic.version = 11 : i64} {
  func.func @_ms_loss_kernel(%arg0: memref<64x128xf32, #tpu.memory_space<vmem>>, %arg1: memref<1x64xi32, #tpu.memory_space<vmem>>, %arg2: memref<64x1xi32, #tpu.memory_space<vmem>>, %arg3: memref<1x1xf32, #tpu.memory_space<smem>>) attributes {dimension_semantics = [], scalar_prefetch = 0 : i64, scratch_operands = 0 : i64, tpu.core_type = #tpu.core_type<tc>} {
    %c0 = arith.constant 0 : index
    %c0_0 = arith.constant 0 : index
    %0 = vector.load %arg0[%c0, %c0_0] : memref<64x128xf32, #tpu.memory_space<vmem>>, vector<64x128xf32>
    %1 = arith.mulf %0, %0 : vector<64x128xf32>
    %cst = arith.constant dense<0.000000e+00> : vector<64xf32>
    %2 = vector.multi_reduction <add>, %1, %cst [1] : vector<64x128xf32> to vector<64xf32>
    %3 = vector.shape_cast %2 : vector<64xf32> to vector<64x1xf32>
    %cst_1 = arith.constant 1.000000e-24 : f32
    %4 = vector.broadcast %cst_1 : f32 to vector<64x1xf32>
    %5 = arith.maximumf %3, %4 : vector<64x1xf32>
    %6 = math.rsqrt %5 : vector<64x1xf32>
    %7 = vector.broadcast %6 : vector<64x1xf32> to vector<64x128xf32>
    %8 = arith.mulf %0, %7 : vector<64x128xf32>
    %cst_2 = arith.constant dense<0.000000e+00> : vector<64x64xf32>
    %9 = tpu.matmul %8, %8, %cst_2 {dimension_numbers = #tpu.dot_dimension_numbers<[1], [1], [0], [0], [0, 0, 1, 0], [], []>} : vector<64x128xf32>, vector<64x128xf32>, vector<64x64xf32> -> vector<64x64xf32>
    %c0_3 = arith.constant 0 : index
    %c0_4 = arith.constant 0 : index
    %10 = vector.load %arg1[%c0_3, %c0_4] : memref<1x64xi32, #tpu.memory_space<vmem>>, vector<1x64xi32>
    %c0_5 = arith.constant 0 : index
    %c0_6 = arith.constant 0 : index
    %11 = vector.load %arg2[%c0_5, %c0_6] : memref<64x1xi32, #tpu.memory_space<vmem>>, vector<64x1xi32>
    %12 = vector.broadcast %11 : vector<64x1xi32> to vector<64x64xi32>
    %13 = vector.broadcast %10 : vector<1x64xi32> to vector<64x64xi32>
    %14 = arith.cmpi eq, %12, %13 : vector<64x64xi32>
    %c0_i32 = arith.constant 0 : i32
    %15 = vector.broadcast %c0_i32 : i32 to vector<64x1xi32>
    %16 = arith.cmpi sge, %11, %15 : vector<64x1xi32>
    %c0_i32_7 = arith.constant 0 : i32
    %17 = vector.broadcast %c0_i32_7 : i32 to vector<1x64xi32>
    %18 = arith.cmpi sge, %10, %17 : vector<1x64xi32>
    %19 = vector.broadcast %16 : vector<64x1xi1> to vector<64x64xi1>
    %20 = vector.broadcast %18 : vector<1x64xi1> to vector<64x64xi1>
    %21 = arith.andi %19, %20 : vector<64x64xi1>
    %22 = tpu.iota {dimensions = array<i32: 0>} : vector<64x64xi32>
    %23 = tpu.iota {dimensions = array<i32: 1>} : vector<64x64xi32>
    %24 = arith.cmpi ne, %22, %23 : vector<64x64xi32>
    %25 = arith.andi %14, %24 : vector<64x64xi1>
    %26 = arith.andi %25, %21 : vector<64x64xi1>
    %cst_8 = arith.constant dense<true> : vector<64x64xi1>
    %27 = arith.xori %14, %cst_8 : vector<64x64xi1>
    %28 = arith.andi %27, %21 : vector<64x64xi1>
    %cst_9 = arith.constant 0xFF800000 : f32
    %29 = vector.broadcast %cst_9 : f32 to vector<64x64xf32>
    %30 = arith.select %28, %9, %29 : vector<64x64xi1>, vector<64x64xf32>
    %cst_10 = arith.constant dense<0xFF800000> : vector<64xf32>
    %31 = vector.multi_reduction <maximumf>, %30, %cst_10 [1] : vector<64x64xf32> to vector<64xf32>
    %32 = vector.shape_cast %31 : vector<64xf32> to vector<64x1xf32>
    %cst_11 = arith.constant 0x7F800000 : f32
    %33 = vector.broadcast %cst_11 : f32 to vector<64x64xf32>
    %34 = arith.select %26, %9, %33 : vector<64x64xi1>, vector<64x64xf32>
    %cst_12 = arith.constant dense<0x7F800000> : vector<64xf32>
    %35 = vector.multi_reduction <minimumf>, %34, %cst_12 [1] : vector<64x64xf32> to vector<64xf32>
    %36 = vector.shape_cast %35 : vector<64xf32> to vector<64x1xf32>
    %cst_13 = arith.constant 1.000000e-01 : f32
    %37 = vector.broadcast %cst_13 : f32 to vector<64x64xf32>
    %38 = arith.subf %9, %37 : vector<64x64xf32>
    %39 = vector.broadcast %32 : vector<64x1xf32> to vector<64x64xf32>
    %40 = arith.cmpf olt, %38, %39 : vector<64x64xf32>
    %41 = arith.andi %26, %40 : vector<64x64xi1>
    %cst_14 = arith.constant 1.000000e-01 : f32
    %42 = vector.broadcast %cst_14 : f32 to vector<64x64xf32>
    %43 = arith.addf %9, %42 : vector<64x64xf32>
    %44 = vector.broadcast %36 : vector<64x1xf32> to vector<64x64xf32>
    %45 = arith.cmpf ogt, %43, %44 : vector<64x64xf32>
    %46 = arith.andi %28, %45 : vector<64x64xi1>
    %cst_15 = arith.constant 5.000000e-01 : f32
    %47 = vector.broadcast %cst_15 : f32 to vector<64x64xf32>
    %48 = arith.subf %47, %9 : vector<64x64xf32>
    %cst_16 = arith.constant 2.000000e+00 : f32
    %49 = vector.broadcast %cst_16 : f32 to vector<64x64xf32>
    %50 = arith.mulf %49, %48 : vector<64x64xf32>
    %cst_17 = arith.constant 0xFF800000 : f32
    %51 = vector.broadcast %cst_17 : f32 to vector<64x64xf32>
    %52 = arith.select %41, %50, %51 : vector<64x64xi1>, vector<64x64xf32>
    %cst_18 = arith.constant dense<0xFF800000> : vector<64xf32>
    %53 = vector.multi_reduction <maximumf>, %52, %cst_18 [1] : vector<64x64xf32> to vector<64xf32>
    %54 = vector.shape_cast %53 : vector<64xf32> to vector<64x1xf32>
    %cst_19 = arith.constant 0.000000e+00 : f32
    %55 = vector.broadcast %cst_19 : f32 to vector<64x1xf32>
    %56 = arith.maximumf %54, %55 : vector<64x1xf32>
    %57 = vector.broadcast %56 : vector<64x1xf32> to vector<64x64xf32>
    %58 = arith.subf %52, %57 : vector<64x64xf32>
    %59 = math.exp %58 : vector<64x64xf32>
    %cst_20 = arith.constant 0.000000e+00 : f32
    %60 = vector.broadcast %cst_20 : f32 to vector<64x64xf32>
    %61 = arith.select %41, %59, %60 : vector<64x64xi1>, vector<64x64xf32>
    %cst_21 = arith.constant dense<0.000000e+00> : vector<64xf32>
    %62 = vector.multi_reduction <add>, %61, %cst_21 [1] : vector<64x64xf32> to vector<64xf32>
    %63 = vector.shape_cast %62 : vector<64xf32> to vector<64x1xf32>
    %cst_22 = arith.constant 0.000000e+00 : f32
    %64 = vector.broadcast %cst_22 : f32 to vector<64x1xf32>
    %65 = arith.subf %64, %56 : vector<64x1xf32>
    %66 = math.exp %65 : vector<64x1xf32>
    %67 = arith.addf %63, %66 : vector<64x1xf32>
    %68 = math.log %67 : vector<64x1xf32>
    %69 = arith.addf %56, %68 : vector<64x1xf32>
    %70 = arith.extui %41 : vector<64x64xi1> to vector<64x64xi32>
    %71 = arith.sitofp %70 : vector<64x64xi32> to vector<64x64xf32>
    %cst_23 = arith.constant dense<0.000000e+00> : vector<64xf32>
    %72 = vector.multi_reduction <add>, %71, %cst_23 [1] : vector<64x64xf32> to vector<64xf32>
    %73 = vector.shape_cast %72 : vector<64xf32> to vector<64x1xf32>
    %cst_24 = arith.constant 0.000000e+00 : f32
    %74 = vector.broadcast %cst_24 : f32 to vector<64x1xf32>
    %75 = arith.cmpf ogt, %73, %74 : vector<64x1xf32>
    %cst_25 = arith.constant 2.000000e+00 : f32
    %76 = vector.broadcast %cst_25 : f32 to vector<64x1xf32>
    %77 = arith.divf %69, %76 : vector<64x1xf32>
    %cst_26 = arith.constant 0.000000e+00 : f32
    %78 = vector.broadcast %cst_26 : f32 to vector<64x1xf32>
    %79 = arith.select %75, %77, %78 : vector<64x1xi1>, vector<64x1xf32>
    %cst_27 = arith.constant 5.000000e-01 : f32
    %80 = vector.broadcast %cst_27 : f32 to vector<64x64xf32>
    %81 = arith.subf %9, %80 : vector<64x64xf32>
    %cst_28 = arith.constant 5.000000e+01 : f32
    %82 = vector.broadcast %cst_28 : f32 to vector<64x64xf32>
    %83 = arith.mulf %82, %81 : vector<64x64xf32>
    %cst_29 = arith.constant 0xFF800000 : f32
    %84 = vector.broadcast %cst_29 : f32 to vector<64x64xf32>
    %85 = arith.select %46, %83, %84 : vector<64x64xi1>, vector<64x64xf32>
    %cst_30 = arith.constant dense<0xFF800000> : vector<64xf32>
    %86 = vector.multi_reduction <maximumf>, %85, %cst_30 [1] : vector<64x64xf32> to vector<64xf32>
    %87 = vector.shape_cast %86 : vector<64xf32> to vector<64x1xf32>
    %cst_31 = arith.constant 0.000000e+00 : f32
    %88 = vector.broadcast %cst_31 : f32 to vector<64x1xf32>
    %89 = arith.maximumf %87, %88 : vector<64x1xf32>
    %90 = vector.broadcast %89 : vector<64x1xf32> to vector<64x64xf32>
    %91 = arith.subf %85, %90 : vector<64x64xf32>
    %92 = math.exp %91 : vector<64x64xf32>
    %cst_32 = arith.constant 0.000000e+00 : f32
    %93 = vector.broadcast %cst_32 : f32 to vector<64x64xf32>
    %94 = arith.select %46, %92, %93 : vector<64x64xi1>, vector<64x64xf32>
    %cst_33 = arith.constant dense<0.000000e+00> : vector<64xf32>
    %95 = vector.multi_reduction <add>, %94, %cst_33 [1] : vector<64x64xf32> to vector<64xf32>
    %96 = vector.shape_cast %95 : vector<64xf32> to vector<64x1xf32>
    %cst_34 = arith.constant 0.000000e+00 : f32
    %97 = vector.broadcast %cst_34 : f32 to vector<64x1xf32>
    %98 = arith.subf %97, %89 : vector<64x1xf32>
    %99 = math.exp %98 : vector<64x1xf32>
    %100 = arith.addf %96, %99 : vector<64x1xf32>
    %101 = math.log %100 : vector<64x1xf32>
    %102 = arith.addf %89, %101 : vector<64x1xf32>
    %103 = arith.extui %46 : vector<64x64xi1> to vector<64x64xi32>
    %104 = arith.sitofp %103 : vector<64x64xi32> to vector<64x64xf32>
    %cst_35 = arith.constant dense<0.000000e+00> : vector<64xf32>
    %105 = vector.multi_reduction <add>, %104, %cst_35 [1] : vector<64x64xf32> to vector<64xf32>
    %106 = vector.shape_cast %105 : vector<64xf32> to vector<64x1xf32>
    %cst_36 = arith.constant 0.000000e+00 : f32
    %107 = vector.broadcast %cst_36 : f32 to vector<64x1xf32>
    %108 = arith.cmpf ogt, %106, %107 : vector<64x1xf32>
    %cst_37 = arith.constant 5.000000e+01 : f32
    %109 = vector.broadcast %cst_37 : f32 to vector<64x1xf32>
    %110 = arith.divf %102, %109 : vector<64x1xf32>
    %cst_38 = arith.constant 0.000000e+00 : f32
    %111 = vector.broadcast %cst_38 : f32 to vector<64x1xf32>
    %112 = arith.select %108, %110, %111 : vector<64x1xi1>, vector<64x1xf32>
    %113 = arith.addf %79, %112 : vector<64x1xf32>
    %cst_39 = arith.constant 0.000000e+00 : f32
    %114 = vector.broadcast %cst_39 : f32 to vector<64x1xf32>
    %115 = arith.cmpf ogt, %113, %114 : vector<64x1xf32>
    %cst_40 = arith.constant 0.000000e+00 : f32
    %116 = vector.broadcast %cst_40 : f32 to vector<64x1xf32>
    %117 = arith.select %115, %113, %116 : vector<64x1xi1>, vector<64x1xf32>
    %118 = vector.shape_cast %117 : vector<64x1xf32> to vector<1x64x1xf32>
    %cst_41 = arith.constant dense<0.000000e+00> : vector<1xf32>
    %119 = vector.multi_reduction <add>, %118, %cst_41 [1, 2] : vector<1x64x1xf32> to vector<1xf32>
    %120 = vector.shape_cast %119 : vector<1xf32> to vector<1x1x1xf32>
    %121 = vector.extract %120[0, 0, 0] : f32 from vector<1x1x1xf32>
    %122 = arith.extui %115 : vector<64x1xi1> to vector<64x1xi32>
    %123 = arith.sitofp %122 : vector<64x1xi32> to vector<64x1xf32>
    %124 = vector.shape_cast %123 : vector<64x1xf32> to vector<1x64x1xf32>
    %cst_42 = arith.constant dense<0.000000e+00> : vector<1xf32>
    %125 = vector.multi_reduction <add>, %124, %cst_42 [1, 2] : vector<1x64x1xf32> to vector<1xf32>
    %126 = vector.shape_cast %125 : vector<1xf32> to vector<1x1x1xf32>
    %127 = vector.extract %126[0, 0, 0] : f32 from vector<1x1x1xf32>
    %cst_43 = arith.constant 0.000000e+00 : f32
    %128 = arith.cmpf ogt, %127, %cst_43 : f32
    %cst_44 = arith.constant 1.000000e+00 : f32
    %129 = arith.maximumf %127, %cst_44 : f32
    %130 = arith.divf %121, %129 : f32
    %cst_45 = arith.constant 0.000000e+00 : f32
    %131 = arith.select %128, %130, %cst_45 : f32
    %c0_46 = arith.constant 0 : index
    %c0_47 = arith.constant 0 : index
    %132 = memref.load %arg3[%c0_46, %c0_47] : memref<1x1xf32, #tpu.memory_space<smem>>
    memref.store %131, %arg3[%c0_46, %c0_47] : memref<1x1xf32, #tpu.memory_space<smem>>
    return
  }
}

</mosaic_0001>

<bundles_post_ra>
// kernel: tpu_custom_call.1
= control target key start
LH: loop header
LB: loop body
LE: loop exit
PB: predicated region body
PF: predicated region fallthrough
CT: control target
= control target key end

     0   :  { %s2509_s0 = inlined_call_operand.vmem [shape: f32[64,128], index: 0, kind: input, shape index: {}]   ;;  %s2510_s1 = inlined_call_operand.vmem [shape: s32[1,64], index: 1, kind: input, shape index: {}]   ;;  %s2511_s2 = inlined_call_operand.vmem [shape: s32[64,1], index: 2, kind: input, shape index: {}]   ;;  %s2512_s3 = inlined_call_operand.hbm [shape: f32[1,1], index: 3, kind: output, shape index: {}]  }
   0x1   :  { %v1297_v0 = vld [vmem:[%s2509_s0 + $0x38] sm:$0xff]  ;;  %v1302_v1 = vld [vmem:[%s2509_s0 + $0x28] sm:$0xff] }
   0x2   :  { %v1307_v2 = vld [vmem:[%s2509_s0 + $0x18] sm:$0xff]  ;;  %v30_v3 = vmul.f32 %v1297_v0, %v1297_v0  ;;  %v28_v4 = vmul.f32 %v1302_v1, %v1302_v1 }
   0x3   :  { %v26_v5 = vmul.f32 %v1307_v2, %v1307_v2 }
   0x4   :  { %8 = vsyncpa [#allocation3], 0  ;;  %45 = vadd.xlane.f32.xlu0 %v30_v3  ;;  %41 = vadd.xlane.f32.xlu1 %v28_v4  ;;  %v1318_v6 = vld [vmem:[%s2509_s0 + $0x30] sm:$0xff]  ;;  %v1323_v7 = vld [vmem:[%s2509_s0 + $0x20] sm:$0xff]  ;;  %v1267_v16 = vmov 0   ;;  %s1272_s20 = smov 1.0  }
   0x5   :  { %37 = vadd.xlane.f32.xlu2 %v26_v5  ;;  %v1328_v8 = vld [vmem:[%s2509_s0 + $0x10] sm:$0xff]  ;;  %v29_v9 = vmul.f32 %v1318_v6, %v1318_v6  ;;  %v27_v10 = vmul.f32 %v1323_v7, %v1323_v7  ;;  %v1339_v12 = vld [vmem:[%s2509_s0 + $0x8] sm:$0xff]  ;;  %v1344_v13 = vld [vmem:[%s2509_s0] sm:$0xff]  ;;  %1133 = vset.pattern.permute.xlu1 %v1267_v16  ;;  %s1044_s24 = sshll.u32 %s2512_s3, 4  ;;  %s1273_s27 = smov [#allocation2]   ;;  %s1045_s24 = int_to_ptr.hbm [resolvable:$true] %s1044_s24 }
   0x6   :  { %v25_v11 = vmul.f32 %v1328_v8, %v1328_v8  ;;  %v24_v14 = vmul.f32 %v1339_v12, %v1339_v12  ;;  %v23_v15 = vmul.f32 %v1344_v13, %v1344_v13  ;;  %v185_v17 = vld [vmem:[%s2511_s2] sm:$0xff]  ;;  %1132 = vset.pattern.permute.xlu0 %v1267_v16  ;;  %1131 = vset.pattern.permute.xlu2 %v1267_v16  ;;  %v187_v19 = vld [vmem:[%s2511_s2 + $0x10] sm:$0xff]  ;;  %v186_v20 = vld [vmem:[%s2511_s2 + $0x8] sm:$0xff] }
   0x7   :  { %vm226_vm0 = vcmp.ge.s32.totalorder %v185_v17, 0  ;;  %vm228_vm1 = vcmp.ge.s32.totalorder %v187_v19, 0  ;;  %v188_v27 = vld [vmem:[%s2511_s2 + $0x18] sm:$0xff]  ;;  %vm227_vm2 = vcmp.ge.s32.totalorder %v186_v20, 0  ;;  %v1376_v30 = vld [vmem:[%s2511_s2 + $0x20] sm:$0xff]  ;;  %v190_v38 = vld [vmem:[%s2511_s2 + $0x28] sm:$0xff] }
   0x8   :  { %v235_v18 = vsel %vm226_vm0, 1, %v1267_v16  ;;  %v237_v21 = vsel %vm228_vm1, 1, %v1267_v16  ;;  %v236_v29 = vsel %vm227_vm2, 1, %v1267_v16  ;;  %vm229_vm3 = vcmp.ge.s32.totalorder %v188_v27, 0  ;;  %v1411_v58 = vld [vmem:[%s2511_s2 + $0x30] sm:$0xff] }
   0x9   :  { %v238_v31 = vsel %vm229_vm3, 1, %v1267_v16  ;;  %vm231_vm4 = vcmp.ge.s32.totalorder %v190_v38, 0  ;;  %vm232_vm8 = vcmp.ge.s32.totalorder %v1411_v58, 0  ;;  %vm230_vm13 = vcmp.ge.s32.totalorder %v1376_v30, 0 }
   0xa   :  { %v240_v47 = vsel %vm231_vm4, 1, %v1267_v16 }
   0xc   :  { %43 = vadd.xlane.f32.xlu0 %v29_v9  ;;  %39 = vadd.xlane.f32.xlu1 %v27_v10 }
   0xd   :  { %35 = vadd.xlane.f32.xlu2 %v25_v11 }
  0x14   :  { %33 = vadd.xlane.f32.xlu0 %v24_v14  ;;  %31 = vadd.xlane.f32.xlu1 %v23_v15  ;;  %v1431_v14 = vld [vmem:[%s2511_s2 + $0x38] sm:$0xff] }
  0x25   :  { %194 = vperm.xlu2 %1131, %v185_v17   ;;  %v241_v17 = vsel %vm232_vm8, 1, %v1267_v16 }
  0x28   :  { %197 = vperm.xlu0 %1132, %v186_v20  }
  0x2d   :  { %244 = vperm.xlu1 %1133, %v235_v18   ;;  %247 = vperm.xlu2 %1131, %v236_v29  }
  0x30   :  { %206 = vperm.xlu0 %1132, %v1376_v30  }
  0x35   :  { %250 = vperm.xlu1 %1133, %v237_v21   ;;  %200 = vperm.xlu2 %1131, %v187_v19  }
  0x38   :  { %259 = vperm.xlu0 %1132, %v240_v47  }
  0x3d   :  { %253 = vperm.xlu1 %1133, %v238_v31   ;;  %203 = vperm.xlu2 %1131, %v188_v27  }
  0x40   :  { %215 = vperm.xlu0 %1132, %v1431_v14  }
  0x45   :  { %209 = vperm.xlu1 %1133, %v190_v38  }
  0x4d   :  { %262 = vperm.xlu1 %1133, %v241_v17  }
  0x77   :  { %v46_v22 = vpop.xlane.xlu0 %45  ;;  %v42_v23 = vpop.xlane.xlu1 %41 }
  0x78   :  { %v54_v24 = vmax.f32 %v46_v22, 1e-24  ;;  %v1364_v25 = vmax.f32 %v42_v23, 1e-24  ;;  %v38_v26 = vpop.xlane.xlu2 %37 }
  0x79   :  { %v1369_v28 = vmax.f32 %v38_v26, 1e-24  ;;  %v239_v26 = vsel %vm230_vm13, 1, %v1267_v16 }
  0x7a   :  { %1135 = vrsqrt.f32 %v54_v24  ;;  %vm131_vm6 = vweird.f32 %v54_v24  ;;  %vm111_vm9 = vweird.f32 %v1364_v25  ;;  %256 = vperm.xlu2 %1131, %v239_v26  }
  0x7b   :  { %1137 = vrsqrt.f32 %v1364_v25  ;;  %vm91_vm2 = vweird.f32 %v1369_v28 }
  0x7c   :  { %1139 = vrsqrt.f32 %v1369_v28 }
  0x7f   :  { %v44_v32 = vpop.xlane.xlu0 %43  ;;  %v40_v33 = vpop.xlane.xlu1 %39 }
  0x80   :  { %v1136_v34 = vpop.eup %1135  ;;  %v1381_v35 = vmax.f32 %v44_v32, 1e-24  ;;  %v1383_v36 = vmax.f32 %v40_v33, 1e-24  ;;  %v36_v37 = vpop.xlane.xlu2 %35 }
  0x81   :  { %v1388_v39 = vpop.eup %1137  ;;  %v126_v40 = vmul.f32 %v1136_v34, %v54_v24  ;;  %v1390_v41 = vmax.f32 %v36_v37, 1e-24  ;;  %vm132_vm5 = vweird.f32 %v1136_v34 }
  0x82   :  { %v106_v42 = vmul.f32 %v1388_v39, %v1364_v25  ;;  %1141 = vrsqrt.f32 %v1381_v35  ;;  %v1396_v44 = vpop.eup %1139  ;;  %vm133_vm7 = vmor %vm131_vm6, %vm132_vm5  ;;  %vm112_vm10 = vweird.f32 %v1388_v39  ;;  %vm121_vm12 = vweird.f32 %v1381_v35  ;;  %212 = vperm.xlu2 %1131, %v1411_v58   ;;  %v184_v58 = vld [vmem:[%s2510_s1] sm:$0x1] }
  0x83   :  { %v127_v43 = vmul.f32 %v1136_v34, %v126_v40  ;;  %1143 = vrsqrt.f32 %v1383_v36  ;;  %v86_v49 = vmul.f32 %v1396_v44, %v1369_v28  ;;  %vm1456_vm15 = vmor %vm111_vm9, %vm112_vm10  ;;  %vm101_vm0 = vweird.f32 %v1383_v36 }
  0x84   :  { %v107_v45 = vmul.f32 %v1388_v39, %v106_v42  ;;  %1145 = vrsqrt.f32 %v1390_v41  ;;  %vm92_vm3 = vweird.f32 %v1396_v44  ;;  %vm81_vm6 = vweird.f32 %v1390_v41 }
  0x85   :  { %v128_v46 = vmul.f32 0.5, %v127_v43  ;;  %v87_v63 = vmul.f32 %v1396_v44, %v86_v49  ;;  %vm1488_vm5 = vmor %vm91_vm2, %vm92_vm3  ;;  %vm233_vm9 = vcmp.ge.s32.totalorder %v1431_v14, 0  ;;  %v2654_v14 = vmov 0 }
  0x86   :  { %v108_v53 = vmul.f32 0.5, %v107_v45 }
  0x87   :  { %v129_v48 = vsub.f32 1.5, %v128_v46  ;;  %v34_v50 = vpop.xlane.xlu0 %33  ;;  %v32_v51 = vpop.xlane.xlu1 %31  ;;  %v88_v20 = vmul.f32 0.5, %v87_v63 }
  0x88   :  { %v1142_v52 = vpop.eup %1141  ;;  %v1403_v54 = vmax.f32 %v34_v50, 1e-24  ;;  %v1418_v61 = vmax.f32 %v32_v51, 1e-24  ;;  %v109_v5 = vsub.f32 1.5, %v108_v53  ;;  %v242_v50 = vsel %vm233_vm9, 1, %v1267_v16 }
  0x89   :  { %v1405_v55 = vpop.eup %1143  ;;  %v130_v56 = vmul.f32 %v1136_v34, %v129_v48  ;;  %v116_v57 = vmul.f32 %v1142_v52, %v1381_v35  ;;  %vm122_vm11 = vweird.f32 %v1142_v52  ;;  %v89_v32 = vsub.f32 1.5, %v88_v20 }
  0x8a   :  { %v1413_v59 = vpop.eup %1145  ;;  %v96_v60 = vmul.f32 %v1405_v55, %v1383_v36  ;;  %1147 = vrsqrt.f32 %v1403_v54  ;;  %v110_v19 = vmul.f32 %v1388_v39, %v109_v5  ;;  %vm123_vm14 = vmor %vm121_vm12, %vm122_vm11  ;;  %vm102_vm1 = vweird.f32 %v1405_v55  ;;  %265 = vperm.xlu2 %1131, %v242_v50  }
  0x8b   :  { %v134_v62 = vsel %vm133_vm7, %v1136_v34, %v130_v56  ;;  %v117_v3 = vmul.f32 %v1142_v52, %v116_v57  ;;  %v76_v11 = vmul.f32 %v1413_v59, %v1390_v41  ;;  %1149 = vrsqrt.f32 %v1418_v61  ;;  %vm103_vm4 = vmor %vm101_vm0, %vm102_vm1 }
  0x8c   :  { %v1422_v4 = vmul.f32 %v134_v62, %v1297_v0  ;;  %v97_v9 = vmul.f32 %v1405_v55, %v96_v60  ;;  %v114_v31 = vsel %vm1456_vm15, %v1388_v39, %v110_v19  ;;  %v90_v38 = vmul.f32 %v1396_v44, %v89_v32 }
  0x8d   :  { %v118_v10 = vmul.f32 0.5, %v117_v3  ;;  %v77_v23 = vmul.f32 %v1413_v59, %v76_v11  ;;  %vm82_vm7 = vweird.f32 %v1413_v59  ;;  %vm71_vm10 = vweird.f32 %v1403_v54  ;;  %v1543_v3 = vld [vmem:[%s2510_s1] ss:$0 sm:$0xff] }
  0x8e   :  { %v98_v15 = vmul.f32 0.5, %v97_v9  ;;  %151 = vmatpush.xpose.msra.mxu0 %v1422_v4  ;;  %1094 = vmatpush.xpose.msra.mxu1 %v1422_v4  ;;  %v94_v36 = vsel %vm1488_vm5, %v1396_v44, %v90_v38  ;;  %vm1504_vm8 = vmor %vm81_vm6, %vm82_vm7  ;;  %vm61_vm12 = vweird.f32 %v1418_v61  ;;  %vm234_vm0 = vcmp.ge.s32.totalorder %v184_v58, 0 }
  0x8f   :  { %v119_v0 = vsub.f32 1.5, %v118_v10  ;;  %1095 = vmatpush.xpose.msra.mxu2 %v1422_v4  ;;  %1096 = vmatpush.xpose.msra.mxu3 %v1422_v4  ;;  %v78_v34 = vmul.f32 0.5, %v77_v23  ;;  %v275_v62 = vsel %vm234_vm0, 1, %v1267_v16  ;;  %v2578_v11 = vmov 0 }
  0x90   :  { %v1441_v18 = vpop.eup %1147  ;;  %v99_v22 = vsub.f32 1.5, %v98_v15  ;;  %v276_v5 = vperm.slane %v275_v62, 0  ;;  %v2584_v19 = vmov 0  ;;  %v2586_v20 = vmov 0 }
  0x91   :  { %v120_v21 = vmul.f32 %v1142_v52, %v119_v0  ;;  %v66_v24 = vmul.f32 %v1441_v18, %v1403_v54  ;;  %v1461_v30 = vpop.eup %1149  ;;  %v79_v40 = vsub.f32 1.5, %v78_v34  ;;  %vm72_vm11 = vweird.f32 %v1441_v18 }
  0x92   :  { %v100_v25 = vmul.f32 %v1405_v55, %v99_v22  ;;  %v56_v37 = vmul.f32 %v1461_v30, %v1418_v61  ;;  %vm62_vm13 = vweird.f32 %v1461_v30  ;;  %vm1553_vm3 = vcmp.eq.s32.totalorder %v276_v5, 1 }
  0x93   :  { %v124_v29 = vsel %vm123_vm14, %v1142_v52, %v120_v21  ;;  %v67_v35 = vmul.f32 %v1441_v18, %v66_v24  ;;  %v80_v45 = vmul.f32 %v1413_v59, %v79_v40  ;;  %vm73_vm14 = vmor %vm71_vm10, %vm72_vm11  ;;  %v2582_v0 = vmov 0 }
  0x94   :  { %v1467_v33 = vmul.f32 %v124_v29, %v1318_v6  ;;  %v1481_v6 = vmul.f32 %v114_v31, %v1302_v1  ;;  %v104_v39 = vsel %vm103_vm4, %v1405_v55, %v100_v25  ;;  %v57_v28 = vmul.f32 %v1461_v30, %v56_v37  ;;  %vm63_vm15 = vmor %vm61_vm12, %vm62_vm13 }
  0x95   :  { %v68_v42 = vmul.f32 0.5, %v67_v35  ;;  %v139_v1 = vmul.f32 %v104_v39, %v1323_v7  ;;  %v138_v7 = vmul.f32 %v94_v36, %v1307_v2  ;;  %v84_v44 = vsel %vm1504_vm8, %v1413_v59, %v80_v45 }
  0x96   :  { %152 = vmatpush.xpose.msra.mxu0 %v1467_v33  ;;  %1097 = vmatpush.xpose.msra.mxu1 %v1467_v33  ;;  %v58_v47 = vmul.f32 0.5, %v57_v28  ;;  %v137_v2 = vmul.f32 %v84_v44, %v1328_v8  ;;  %v286_v59 = vlaneseq  ;;  %vm2517_vm8 = vmmov 1  }
  0x97   :  { %1098 = vmatpush.xpose.msra.mxu2 %v1467_v33  ;;  %1099 = vmatpush.xpose.msra.mxu3 %v1467_v33  ;;  %v69_v46 = vsub.f32 1.5, %v68_v42  ;;  %v2588_v24 = vmov 0  ;;  %v2592_v25 = vmov 0  ;;  %v2594_v34 = vmov 0 }
  0x98   :  { %v59_v49 = vsub.f32 1.5, %v58_v47  ;;  %v1535_v61 = vshrl.u32 %v286_v59, 7  ;;  %v2603_v45 = vmov 0  ;;  %v2612_v44 = vmov 0 }
  0x99   :  { %v70_v48 = vmul.f32 %v1441_v18, %v69_v46  ;;  %v2628_v58 = vmov 0 }
  0x9a   :  { %153 = vmatpush.xpose.msra.mxu0 %v1481_v6  ;;  %1100 = vmatpush.xpose.msra.mxu1 %v1481_v6  ;;  %v60_v52 = vmul.f32 %v1461_v30, %v59_v49  ;;  %v1547_v9 = vpop.permute.xlu0 %197  ;;  %v289_v10 = vadd.s32 16, %v1535_v61  ;;  %v293_v35 = vadd.s32 48, %v1535_v61  ;;  %v290_v43 = vadd.s32 24, %v1535_v61 }
  0x9b   :  { %1101 = vmatpush.xpose.msra.mxu2 %v1481_v6  ;;  %1102 = vmatpush.xpose.msra.mxu3 %v1481_v6  ;;  %v74_v51 = vsel %vm73_vm14, %v1441_v18, %v70_v48  ;;  %v291_v18 = vadd.s32 32, %v1535_v61  ;;  %v288_v36 = vadd.s32 8, %v1535_v61  ;;  %v292_v50 = vadd.s32 40, %v1535_v61 }
  0x9c   :  { %v136_v53 = vmul.f32 %v74_v51, %v1339_v12  ;;  %v64_v54 = vsel %vm63_vm15, %v1461_v30, %v60_v52  ;;  %v195_v12 = vpop.permute.xlu2 %194  ;;  %v2590_v30 = vmov 0 }
  0x9d   :  { %v135_v8 = vmul.f32 %v64_v54, %v1344_v13  ;;  %vm218_vm2 = vcmp.eq.s32.totalorder %v195_v12, %v1543_v3 }
  0x9e   :  { %154 = vmatpush.xpose.msra.mxu0 %v139_v1  ;;  %1103 = vmatpush.xpose.msra.mxu1 %v139_v1  ;;  %vm1564_vm9 = vmxor %vm218_vm2, %vm2517_vm8 }
  0x9f   :  { %1104 = vmatpush.xpose.msra.mxu2 %v139_v1  ;;  %1105 = vmatpush.xpose.msra.mxu3 %v139_v1  ;;  %v245_v55 = vpop.permute.xlu1 %244 }
  0xa0   :  { %vm267_vm4 = vcmp.eq.s32.totalorder %v245_v55, 1 }
  0xa1   :  { %vm1572_vm11 = vmand %vm267_vm4, %vm1553_vm3 }
  0xa2   :  { %155 = vmatpush.xpose.msra.mxu0 %v138_v7  ;;  %1106 = vmatpush.xpose.msra.mxu1 %v138_v7  ;;  %v2583_v0 = vsel %vm1572_vm11, 4294967295, %v2582_v0  ;;  %v207_v21 = vpop.permute.xlu0 %206  ;;  %vm2515_vm15 = vmand %vm1564_vm9, %vm1572_vm11 }
  0xa3   :  { %1107 = vmatpush.xpose.msra.mxu2 %v138_v7  ;;  %1108 = vmatpush.xpose.msra.mxu3 %v138_v7 }
  0xa4   :  { %v1528_v56 = vpop.permute.xlu2 %247 }
  0xa6   :  { %156 = vmatpush.xpose.msra.mxu0 %v137_v2  ;;  %1109 = vmatpush.xpose.msra.mxu1 %v137_v2 }
  0xa7   :  { %1110 = vmatpush.xpose.msra.mxu2 %v137_v2  ;;  %1111 = vmatpush.xpose.msra.mxu3 %v137_v2  ;;  %v251_v13 = vpop.permute.xlu1 %250 }
  0xa8   :  { %vm269_vm10 = vcmp.eq.s32.totalorder %v251_v13, 1  ;;  %v2625_v13 = vmov 0 }
  0xa9   :  { %vm1585_vm13 = vmand %vm269_vm10, %vm1553_vm3 }
  0xaa   :  { %157 = vmatpush.xpose.msra.mxu0 %v136_v53  ;;  %1112 = vmatpush.xpose.msra.mxu1 %v136_v53  ;;  %v2587_v20 = vsel %vm1585_vm13, 4294967295, %v2586_v20  ;;  %v260_v48 = vpop.permute.xlu0 %259 }
  0xab   :  { %1113 = vmatpush.xpose.msra.mxu2 %v136_v53  ;;  %1114 = vmatpush.xpose.msra.mxu3 %v136_v53 }
  0xac   :  { %v201_v57 = vpop.permute.xlu2 %200 }
  0xad   :  { %vm220_vm7 = vcmp.eq.s32.totalorder %v201_v57, %v1543_v3 }
  0xae   :  { %158 = vmatpush.xpose.msra.mxu0 %v135_v8  ;;  %1115 = vmatpush.xpose.msra.mxu1 %v135_v8 }
  0xaf   :  { %1116 = vmatpush.xpose.msra.mxu2 %v135_v8  ;;  %1117 = vmatpush.xpose.msra.mxu3 %v135_v8  ;;  %v1533_v60 = vpop.permute.xlu1 %253 }
  0xb1   :  { %159 = vmatmul.f32.vlgmr.msra.gmra.mxu0 %v135_v8  ;;  %165 = vmatmul.f32.vlgmr.msra.gmra.mxu1 %v137_v2  ;;  %v2619_v8 = vmov 0 }
  0xb2   :  { %171 = vmatmul.f32.vlgmr.msra.gmra.mxu2 %v139_v1  ;;  %177 = vmatmul.f32.vlgmr.msra.gmra.mxu3 %v1467_v33  ;;  %v2601_v1 = vmov 0  ;;  %v216_v5 = vpop.permute.xlu0 %215 }
  0xb4   :  { %v1538_v63 = vpop.permute.xlu2 %203 }
  0xb7   :  { %v1568_v15 = vpop.permute.xlu1 %209 }
  0xb9   :  { %162 = vmatmul.f32.gmra.mxu0 %v136_v53  ;;  %168 = vmatmul.f32.gmra.mxu1 %v138_v7  ;;  %v2615_v53 = vmov 0 }
  0xba   :  { %174 = vmatmul.f32.gmra.mxu2 %v1481_v6  ;;  %180 = vmatmul.f32.gmra.mxu3 %v1422_v4  ;;  %v1545_v4 = vand.u32 127, %v286_v59 }
  0xbc   :  { %vm297_vm1 = vcmp.ne.s32.totalorder %v1535_v61, %v1545_v4  ;;  %vm299_vm6 = vcmp.ne.s32.totalorder %v289_v10, %v1545_v4  ;;  %vm301_vm0 = vcmp.ne.s32.totalorder %v291_v18, %v1545_v4  ;;  %v2712_v18 = vmov 0 }
  0xbd   :  { %vm1557_vm5 = vmand %vm218_vm2, %vm297_vm1  ;;  %vm222_vm1 = vcmp.eq.s32.totalorder %v207_v21, %v1543_v3  ;;  %vm2516_vm2 = vcmask 523264   ;;  %v2634_v21 = vmov 0 }
  0xbe   :  { %v2579_v11 = vsel %vm1557_vm5, 4294967295, %v2578_v11  ;;  %vm1579_vm12 = vmand %vm220_vm7, %vm299_vm6 }
  0xbf   :  { %v2585_v19 = vsel %vm1579_vm12, 4294967295, %v2584_v19  ;;  %vm2513_vm4 = vmand %vm1557_vm5, %vm1572_vm11  ;;  %v263_v37 = vpop.permute.xlu1 %262  ;;  %vm2614_vm5 = vcmp.eq.s32.totalorder %v1538_v63, %v1543_v3 }
  0xc0   :  { %vm2514_vm6 = vmand %vm1579_vm12, %vm1585_vm13 }
  0xd4   :  { %v257_v17 = vpop.permute.xlu2 %256 }
  0xd5   :  { %vm271_vm14 = vcmp.eq.s32.totalorder %v257_v17, 1 }
  0xd6   :  { %vm1609_vm10 = vmand %vm271_vm14, %vm1553_vm3 }
  0xd7   :  { %v2589_v24 = vsel %vm1609_vm10, 4294967295, %v2588_v24  ;;  %vm1633_vm14 = vmand %vm222_vm1, %vm301_vm0 }
  0xd8   :  { %v2591_v30 = vsel %vm1633_vm14, 4294967295, %v2590_v30  ;;  %vm1650_vm0 = vmxor %vm222_vm1, %vm2517_vm8 }
  0xd9   :  { %v2595_v34 = vsel %vm1650_vm0, 4294967295, %v2594_v34  ;;  %vm2598_vm12 = vmand %vm1633_vm14, %vm1609_vm10 }
  0xdc   :  { %v213_v6 = vpop.permute.xlu2 %212 }
 0x12e   :  { %v1599_v22 = vpop.f32.mrf.mxu0  ;;  %v1601_v23 = vpop.f32.mrf.mxu1 }
 0x12f   :  { %v337_v26 = vsel %vm2515_vm15, %v1599_v22, -inf  ;;  %v370_v27 = vsel %vm2513_vm4, %v1599_v22, inf  ;;  %v372_v29 = vsel %vm2514_vm6, %v1601_v23, inf  ;;  %vm1643_vm4 = vmxor %vm220_vm7, %vm2517_vm8  ;;  %vm268_vm6 = vcmp.eq.s32.totalorder %v1528_v56, 1 }
 0x130   :  { %v346_v31 = vsel %vm2516_vm2, %v337_v26, -inf  ;;  %v378_v32 = vsel %vm2516_vm2, %v370_v27, inf  ;;  %v384_v33 = vsel %vm2516_vm2, %v372_v29, inf  ;;  %v2593_v25 = vsel %vm1643_vm4, 4294967295, %v2592_v25  ;;  %vm2520_vm1 = vmand %vm1643_vm4, %vm1585_vm13 }
 0x131   :  { %347 = vmax.xlane.f32.xlu1 %v346_v31  ;;  %379 = vmin.xlane.f32.xlu2 %v378_v32  ;;  %vm273_vm2 = vcmp.eq.s32.totalorder %v263_v37, 1  ;;  %v339_v39 = vsel %vm2520_vm1, %v1601_v23, -inf  ;;  %vm2524_vm15 = vmand %vm1650_vm0, %vm1609_vm10  ;;  %vm303_vm7 = vcmp.ne.s32.totalorder %v293_v35, %v1545_v4  ;;  %vm2599_vm1 = vmmov 1  }
 0x132   :  { %385 = vmin.xlane.f32.xlu0 %v384_v33  ;;  %vm1679_vm8 = vmand %vm268_vm6, %vm1553_vm3  ;;  %vm2600_vm13 = vcmp.eq.s32.totalorder %v213_v6, %v1543_v3  ;;  %v2641_v31 = vmov 0  ;;  %v2644_v6 = vmov 0 }
 0x133   :  { %vm1702_vm4 = vmxor %vm2600_vm13, %vm2599_vm1 }
 0x134   :  { %v2602_v1 = vsel %vm1702_vm4, 4294967295, %v2601_v1  ;;  %vm2607_vm6 = vmmov %vm2600_vm13 }
 0x135   :  { %v1665_v38 = vpop.f32.mrf.mxu2  ;;  %vm1717_vm10 = vmand %vm2607_vm6, %vm303_vm7  ;;  %v1730_v49 = vpop.f32.mrf.mxu3  ;;  %vm298_vm6 = vcmp.ne.s32.totalorder %v288_v36, %v1545_v4  ;;  %v450_v36 = vsub.f32 0.5, %v1599_v22 }
 0x136   :  { %v374_v42 = vsel %vm2598_vm12, %v1665_v38, inf  ;;  %v341_v28 = vsel %vm2524_vm15, %v1665_v38, -inf  ;;  %vm1709_vm12 = vmand %vm273_vm2, %vm1553_vm3  ;;  %vm2605_vm15 = vcmask 523264   ;;  %vm2611_vm2 = vcmp.eq.s32.totalorder %v1547_v9, %v1543_v3  ;;  %v1736_v2 = vpop.f32.mrf.mxu0  ;;  %v1809_v59 = vpop.f32.mrf.mxu1 }
 0x137   :  { %v2604_v45 = vsel %vm1709_vm12, 4294967295, %v2603_v45  ;;  %v390_v46 = vsel %vm2605_vm15, %v374_v42, inf  ;;  %vm2606_vm14 = vmmov %vm2605_vm15  ;;  %vm300_vm15 = vcmp.ne.s32.totalorder %v290_v43, %v1545_v4  ;;  %v1070_v42 = vadd.f32 -0.5, %v1599_v22 }
 0x138   :  { %v352_v47 = vsel %vm2606_vm14, %v339_v39, -inf  ;;  %vm2610_vm13 = vmmov %vm2606_vm14  ;;  %vm272_vm14 = vcmp.eq.s32.totalorder %v260_v48, 1  ;;  %v1054_v43 = vadd.f32 -0.1, %v1599_v22 }
 0x139   :  { %391 = vmin.xlane.f32.xlu1 %v390_v46  ;;  %353 = vmax.xlane.f32.xlu2 %v352_v47  ;;  %v358_v7 = vsel %vm2610_vm13, %v341_v28, -inf  ;;  %vm1726_vm0 = vmxor %vm2611_vm2, %vm2599_vm1  ;;  %vm270_vm2 = vcmp.eq.s32.totalorder %v1533_v60, 1  ;;  %v266_v60 = vpop.permute.xlu2 %265  ;;  %v426_v28 = vadd.f32 0.1, %v1599_v22 }
 0x13a   :  { %v2613_v44 = vsel %vm1726_vm0, 4294967295, %v2612_v44  ;;  %359 = vmax.xlane.f32.xlu0 %v358_v7  ;;  %vm2532_vm7 = vmand %vm1702_vm4, %vm1709_vm12  ;;  %vm2618_vm4 = vcmp.eq.s32.totalorder %v1547_v9, %v1543_v3  ;;  %v428_v7 = vadd.f32 0.1, %v1601_v23 }
 0x13b   :  { %vm2536_vm13 = vmand %vm1717_vm10, %vm1709_vm12  ;;  %v343_v51 = vsel %vm2532_vm7, %v1730_v49, -inf }
 0x13c   :  { %v376_v52 = vsel %vm2536_vm13, %v1730_v49, inf  ;;  %vm1767_vm11 = vmand %vm2614_vm5, %vm300_vm15  ;;  %vm302_vm5 = vcmp.ne.s32.totalorder %v292_v50, %v1545_v4  ;;  %vm2539_vm15 = vcmp.eq.s32.totalorder %v1568_v15, %v1543_v3  ;;  %v697_v50 = vmul.f32 50.0, %v1070_v42 }
 0x13d   :  { %v2616_v53 = vsel %vm1767_vm11, 4294967295, %v2615_v53  ;;  %vm2617_vm7 = vmand %vm1726_vm0, %vm1679_vm8  ;;  %vm2623_vm0 = vcmask 523264   ;;  %v1811_v62 = vpop.f32.mrf.mxu2  ;;  %v1877_v32 = vpop.f32.mrf.mxu3  ;;  %v432_v42 = vadd.f32 0.1, %v1730_v49 }
 0x13e   :  { %v338_v54 = vsel %vm2617_vm7, %v1736_v2, -inf  ;;  %vm1780_vm12 = vmand %vm2618_vm4, %vm298_vm6  ;;  %v364_v55 = vsel %vm2623_vm0, %v343_v51, -inf  ;;  %v2650_v51 = vmov 0  ;;  %v431_v40 = vadd.f32 0.1, %v1811_v62 }
 0x13f   :  { %v2620_v8 = vsel %vm1780_vm12, 4294967295, %v2619_v8  ;;  %vm1789_vm13 = vmand %vm270_vm2, %vm1553_vm3 }
 0x140   :  { %vm2624_vm7 = vmmov %vm2623_vm0 }
 0x141   :  { %v396_v56 = vsel %vm2624_vm7, %v376_v52, inf  ;;  %vm1797_vm4 = vmand %vm272_vm14, %vm1553_vm3  ;;  %365 = vmax.xlane.f32.xlu1 %v364_v55  ;;  %vm274_vm7 = vcmp.eq.s32.totalorder %v266_v60, 1  ;;  %v458_v52 = vmul.f32 2.0, %v450_v36  ;;  %v1056_v60 = vadd.f32 -0.1, %v1601_v23 }
 0x142   :  { %v2626_v13 = vsel %vm1797_vm4, 4294967295, %v2625_v13  ;;  %vm2627_vm6 = vmmov %vm2623_vm0  ;;  %397 = vmin.xlane.f32.xlu2 %v396_v56 }
 0x143   :  { %v349_v57 = vsel %vm2627_vm6, %v338_v54, -inf  ;;  %vm1805_vm2 = vmand %vm2539_vm15, %vm302_vm5  ;;  %vm2630_vm6 = vcmp.eq.s32.totalorder %v1538_v63, %v1543_v3  ;;  %vm225_vm15 = vcmp.eq.s32.totalorder %v216_v5, %v1543_v3  ;;  %v2638_v63 = vmov 0 }
 0x144   :  { %v2629_v58 = vsel %vm1805_vm2, 4294967295, %v2628_v58  ;;  %350 = vmax.xlane.f32.xlu0 %v349_v57  ;;  %vm2538_vm0 = vmand %vm1780_vm12, %vm1679_vm8  ;;  %v1072_v54 = vadd.f32 -0.5, %v1601_v23  ;;  %v452_v57 = vsub.f32 0.5, %v1601_v23  ;;  %v430_v5 = vadd.f32 0.1, %v1665_v38 }
 0x145   :  { %vm2540_vm14 = vmand %vm1767_vm11, %vm1789_vm13  ;;  %v371_v9 = vsel %vm2538_vm0, %v1736_v2, inf  ;;  %v2665_v23 = vmov 0 }
 0x146   :  { %vm2543_vm5 = vmand %vm1805_vm2, %vm1797_vm4  ;;  %v373_v10 = vsel %vm2540_vm14, %v1809_v59, inf  ;;  %vm2633_vm14 = vcmp.eq.s32.totalorder %v1568_v15, %v1543_v3  ;;  %vm2636_vm2 = vcmask 523264   ;;  %v294_v15 = vadd.s32 56, %v1535_v61 }
 0x147   :  { %v375_v17 = vsel %vm2543_vm5, %v1811_v62, inf  ;;  %vm1847_vm0 = vmxor %vm2630_vm6, %vm2599_vm1  ;;  %v381_v26 = vsel %vm2636_vm2, %v371_v9, inf  ;;  %v699_v9 = vmul.f32 50.0, %v1072_v54 }
 0x148   :  { %vm1856_vm11 = vmxor %vm2633_vm14, %vm2599_vm1 }
 0x149   :  { %v2635_v21 = vsel %vm1856_vm11, 4294967295, %v2634_v21  ;;  %vm2637_vm5 = vmmov %vm2636_vm2  ;;  %382 = vmin.xlane.f32.xlu1 %v381_v26  ;;  %v460_v26 = vmul.f32 2.0, %v452_v57 }
 0x14a   :  { %v387_v27 = vsel %vm2637_vm5, %v373_v10, inf  ;;  %vm1864_vm6 = vmand %vm274_vm7, %vm1553_vm3  ;;  %v1074_v10 = vadd.f32 -0.5, %v1665_v38 }
 0x14b   :  { %v2639_v63 = vsel %vm1864_vm6, 4294967295, %v2638_v63  ;;  %vm2640_vm12 = vmmov %vm2636_vm2  ;;  %388 = vmin.xlane.f32.xlu2 %v387_v27  ;;  %vm304_vm2 = vcmp.ne.s32.totalorder %v294_v15, %v1545_v4 }
 0x14c   :  { %v393_v29 = vsel %vm2640_vm12, %v375_v17, inf  ;;  %vm1873_vm14 = vmxor %vm225_vm15, %vm2599_vm1 }
 0x14d   :  { %v2642_v31 = vsel %vm1873_vm14, 4294967295, %v2641_v31  ;;  %394 = vmin.xlane.f32.xlu0 %v393_v29  ;;  %vm2545_vm3 = vmand %vm1847_vm0, %vm1789_vm13 }
 0x14e   :  { %vm2546_vm12 = vmand %vm1856_vm11, %vm1797_vm4  ;;  %v340_v61 = vsel %vm2545_vm3, %v1809_v59, -inf }
 0x14f   :  { %vm2547_vm1 = vmand %vm1873_vm14, %vm1864_vm6  ;;  %v342_v16 = vsel %vm2546_vm12, %v1811_v62, -inf  ;;  %v355_v35 = vsel %vm2637_vm5, %v340_v61, -inf  ;;  %vm2652_vm14 = vnez %v2579_v11  ;;  %v2660_v11 = vmov 0 }
 0x150   :  { %v344_v33 = vsel %vm2547_vm1, %v1877_v32, -inf  ;;  %vm2643_vm7 = vmmov %vm2637_vm5  ;;  %v701_v61 = vmul.f32 50.0, %v1074_v10  ;;  %v451_v10 = vsub.f32 0.5, %v1736_v2 }
 0x151   :  { %v361_v37 = vsel %vm2643_vm7, %v342_v16, -inf  ;;  %vm1914_vm3 = vmand %vm225_vm15, %vm304_vm2  ;;  %356 = vmax.xlane.f32.xlu1 %v355_v35  ;;  %v1060_v35 = vadd.f32 -0.1, %v1730_v49 }
 0x152   :  { %v2645_v6 = vsel %vm1914_vm3, 4294967295, %v2644_v6  ;;  %vm2646_vm12 = vmmov %vm2637_vm5 }
 0x153   :  { %v367_v39 = vsel %vm2646_vm12, %v344_v33, -inf  ;;  %362 = vmax.xlane.f32.xlu2 %v361_v37  ;;  %vm2548_vm1 = vmand %vm1914_vm3, %vm1864_vm6  ;;  %v456_v37 = vsub.f32 0.5, %v1730_v49 }
 0x154   :  { %v377_v3 = vsel %vm2548_vm1, %v1877_v32, inf  ;;  %vm2647_vm15 = vmmov %vm2637_vm5  ;;  %vm2648_vm5 = vnez %v2583_v0 }
 0x155   :  { %368 = vmax.xlane.f32.xlu0 %v367_v39  ;;  %v399_v4 = vsel %vm2647_vm15, %v377_v3, inf  ;;  %vm2649_vm7 = vmand %vm1564_vm9, %vm2648_vm5  ;;  %vm2656_vm9 = vcmask 523264   ;;  %v1058_v39 = vadd.f32 -0.1, %v1665_v38 }
 0x156   :  { %vm2653_vm6 = vmand %vm2652_vm14, %vm2648_vm5 }
 0x159   :  { %400 = vmin.xlane.f32.xlu1 %v399_v4 }
 0x1a4   :  { %v380_v46 = vpop.xlane.xlu2 %379  ;;  %v348_v47 = vpop.xlane.xlu1 %347 }
 0x1a5   :  { %vm434_vm12 = vcmp.gt.f32.partialorder %v426_v28, %v380_v46  ;;  %v386_v48 = vpop.xlane.xlu0 %385  ;;  %vm410_vm2 = vcmp.lt.f32.partialorder %v1054_v43, %v348_v47  ;;  %v1269_v28 = vmov 0.0   ;;  %v464_v46 = vmul.f32 2.0, %v456_v37 }
 0x1a6   :  { %vm1940_vm15 = vmand %vm2649_vm7, %vm434_vm12  ;;  %vm436_vm1 = vcmp.gt.f32.partialorder %v428_v7, %v386_v48  ;;  %vm2657_vm12 = vnez %v2593_v25  ;;  %vm2658_vm7 = vnez %v2587_v20  ;;  %v1076_v47 = vadd.f32 -0.5, %v1730_v49 }
 0x1a7   :  { %v2651_v51 = vsel %vm1940_vm15, 4294967295, %v2650_v51  ;;  %v1946_v22 = vsel %vm1940_vm15, %v697_v50, -inf  ;;  %vm1954_vm3 = vmand %vm2653_vm6, %vm410_vm2  ;;  %v1078_v43 = vsel %vm1940_vm15, 1.0, %v1269_v28  ;;  %v454_v7 = vsub.f32 0.5, %v1665_v38 }
 0x1a8   :  { %v2655_v14 = vsel %vm1954_vm3, 4294967295, %v2654_v14  ;;  %v713_v55 = vsel %vm2656_vm9, %v1946_v22, -inf  ;;  %v1962_v56 = vsel %vm1954_vm3, %v458_v52, -inf  ;;  %vm2659_vm4 = vmand %vm2657_vm12, %vm2658_vm7  ;;  %vm2667_vm12 = vnez %v2595_v34 }
 0x1a9   :  { %714 = vmax.xlane.f32.xlu1 %v713_v55  ;;  %vm1970_vm14 = vmand %vm2659_vm4, %vm436_vm1  ;;  %vm2663_vm4 = vnez %v2585_v19  ;;  %v2670_v19 = vmov 0  ;;  %v1062_v36 = vsel %vm1954_vm3, 1.0, %v1269_v28  ;;  %vm2680_vm3 = vnez %v2591_v30 }
 0x1aa   :  { %v2661_v11 = vsel %vm1970_vm14, 4294967295, %v2660_v11  ;;  %vm2662_vm6 = vmmov %vm2656_vm9  ;;  %v1981_v27 = vsel %vm1970_vm14, %v699_v9, -inf  ;;  %v2686_v30 = vmov 0  ;;  %v427_v49 = vadd.f32 0.1, %v1736_v2 }
 0x1ab   :  { %v474_v0 = vsel %vm2662_vm6, %v1962_v56, -inf  ;;  %vm2664_vm1 = vmand %vm2663_vm4, %vm2658_vm7  ;;  %vm2668_vm6 = vnez %v2589_v24  ;;  %vm2672_vm7 = vcmask 523264   ;;  %v703_v55 = vmul.f32 50.0, %v1076_v47 }
 0x1ac   :  { %475 = vmax.xlane.f32.xlu2 %v474_v0  ;;  %v354_v17 = vpop.xlane.xlu2 %353  ;;  %v392_v25 = vpop.xlane.xlu1 %391  ;;  %vm2669_vm14 = vmand %vm2667_vm12, %vm2668_vm6  ;;  %vm2675_vm12 = vnez %v2604_v45  ;;  %v462_v57 = vmul.f32 2.0, %v454_v7  ;;  %v1071_v0 = vadd.f32 -0.5, %v1736_v2  ;;  %v429_v37 = vadd.f32 0.1, %v1809_v59 }
 0x1ad   :  { %vm412_vm2 = vcmp.lt.f32.partialorder %v1056_v60, %v354_v17  ;;  %vm438_vm5 = vcmp.gt.f32.partialorder %v430_v5, %v392_v25  ;;  %v360_v29 = vpop.xlane.xlu0 %359  ;;  %vm2681_vm15 = vmand %vm2680_vm3, %vm2668_vm6  ;;  %v2691_v17 = vmov 0 }
 0x1ae   :  { %vm1988_vm9 = vmand %vm2664_vm1, %vm412_vm2  ;;  %v698_v9 = vmul.f32 50.0, %v1071_v0 }
 0x1af   :  { %v2666_v23 = vsel %vm1988_vm9, 4294967295, %v2665_v23  ;;  %v1994_v15 = vsel %vm1988_vm9, %v460_v26, -inf  ;;  %vm2001_vm11 = vmand %vm2669_vm14, %vm438_vm5  ;;  %vm414_vm5 = vcmp.lt.f32.partialorder %v1058_v39, %v360_v29 }
 0x1b0   :  { %v2671_v19 = vsel %vm2001_vm11, 4294967295, %v2670_v19  ;;  %v480_v20 = vsel %vm2672_vm7, %v1994_v15, -inf  ;;  %vm2673_vm2 = vmmov %vm2672_vm7  ;;  %v2011_v33 = vsel %vm2001_vm11, %v701_v61, -inf }
 0x1b1   :  { %v719_v16 = vsel %vm2673_vm2, %v1981_v27, -inf  ;;  %481 = vmax.xlane.f32.xlu0 %v480_v20  ;;  %vm2674_vm4 = vmmov %vm2673_vm2 }
 0x1b2   :  { %720 = vmax.xlane.f32.xlu1 %v719_v16  ;;  %v725_v34 = vsel %vm2674_vm4, %v2011_v33, -inf  ;;  %vm2676_vm7 = vmand %vm1717_vm10, %vm2675_vm12  ;;  %v873_v52 = vsel %vm2674_vm4, %v1078_v43, 0.0  ;;  %vm2684_vm10 = vnez %v2602_v1  ;;  %v1055_v1 = vadd.f32 -0.1, %v1736_v2 }
 0x1b3   :  { %vm2679_vm11 = vmmov %vm2674_vm4  ;;  %v1057_v16 = vadd.f32 -0.1, %v1809_v59  ;;  %v1075_v43 = vadd.f32 -0.5, %v1811_v62 }
 0x1b4   :  { %726 = vmax.xlane.f32.xlu2 %v725_v34  ;;  %v366_v4 = vpop.xlane.xlu1 %365  ;;  %v634_v54 = vsel %vm2679_vm11, %v1062_v36, 0.0  ;;  %vm2043_vm9 = vmand %vm2681_vm15, %vm414_vm5  ;;  %vm2689_vm5 = vnez %v2613_v44  ;;  %v2697_v44 = vmov 0  ;;  %v459_v34 = vmul.f32 2.0, %v451_v10 }
 0x1b5   :  { %v398_v3 = vpop.xlane.xlu2 %397  ;;  %vm416_vm14 = vcmp.lt.f32.partialorder %v1060_v35, %v366_v4  ;;  %vm2685_vm11 = vmand %vm2684_vm10, %vm2675_vm12  ;;  %v2071_v5 = vsel %vm2043_vm9, %v462_v57, -inf  ;;  %vm2695_vm10 = vnez %v2620_v8  ;;  %v453_v35 = vsub.f32 0.5, %v1809_v59 }
 0x1b6   :  { %vm440_vm1 = vcmp.gt.f32.partialorder %v432_v42, %v398_v3  ;;  %vm2032_vm2 = vmand %vm2676_vm7, %vm416_vm14  ;;  %v1073_v42 = vadd.f32 -0.5, %v1809_v59  ;;  %v433_v57 = vadd.f32 0.1, %v1877_v32 }
 0x1b7   :  { %v351_v48 = vpop.xlane.xlu0 %350  ;;  %v2049_v41 = vsel %vm2032_vm2, %v464_v46, -inf  ;;  %vm2056_vm14 = vmand %vm2685_vm11, %vm440_vm1  ;;  %v461_v4 = vmul.f32 2.0, %v453_v35 }
 0x1b8   :  { %v2687_v30 = vsel %vm2056_vm14, 4294967295, %v2686_v30  ;;  %vm2688_vm3 = vmmov %vm2674_vm4  ;;  %v2067_v45 = vsel %vm2056_vm14, %v703_v55, -inf  ;;  %vm411_vm6 = vcmp.lt.f32.partialorder %v1055_v1, %v351_v48  ;;  %v700_v48 = vmul.f32 50.0, %v1073_v42 }
 0x1b9   :  { %874 = vadd.xlane.f32.xlu0 %v873_v52  ;;  %v492_v24 = vsel %vm2688_vm3, %v2049_v41, -inf  ;;  %vm2690_vm1 = vmand %vm2689_vm5, %vm1679_vm8  ;;  %v702_v52 = vmul.f32 50.0, %v1075_v43  ;;  %v455_v1 = vsub.f32 0.5, %v1811_v62  ;;  %vm2726_vm14 = vcmask 523264  }
 0x1ba   :  { %635 = vadd.xlane.f32.xlu1 %v634_v54  ;;  %vm2693_vm7 = vmmov %vm2688_vm3  ;;  %v1066_v43 = vsel %vm2043_vm9, 1.0, %v1269_v28 }
 0x1bb   :  { %v731_v25 = vsel %vm2693_vm7, %v2067_v45, -inf  ;;  %vm2694_vm4 = vmmov %vm2688_vm3 }
 0x1bc   :  { %493 = vmax.xlane.f32.xlu2 %v492_v24  ;;  %v383_v60 = vpop.xlane.xlu1 %382  ;;  %v486_v26 = vsel %vm2694_vm4, %v2071_v5, -inf  ;;  %vm2696_vm11 = vmand %vm2695_vm10, %vm1679_vm8  ;;  %v1059_v24 = vadd.f32 -0.1, %v1811_v62  ;;  %v1077_v62 = vadd.f32 -0.5, %v1877_v32 }
 0x1bd   :  { %vm435_vm15 = vcmp.gt.f32.partialorder %v427_v49, %v383_v60  ;;  %vm2096_vm3 = vmand %vm2696_vm11, %vm411_vm6  ;;  %v1061_v49 = vadd.f32 -0.1, %v1877_v32 }
 0x1be   :  { %vm2079_vm12 = vmand %vm2690_vm1, %vm435_vm15  ;;  %v389_v29 = vpop.xlane.xlu2 %388  ;;  %v2698_v44 = vsel %vm2096_vm3, 4294967295, %v2697_v44  ;;  %v2108_v39 = vsel %vm2096_vm3, %v459_v34, -inf  ;;  %vm2700_vm1 = vnez %v2616_v53  ;;  %v1063_v60 = vsel %vm2096_vm3, 1.0, %v1269_v28 }
 0x1bf   :  { %v2692_v17 = vsel %vm2079_vm12, 4294967295, %v2691_v17  ;;  %v2089_v2 = vsel %vm2079_vm12, %v698_v9, -inf  ;;  %vm2699_vm15 = vmmov %vm2694_vm4  ;;  %v1079_v3 = vsel %vm2079_vm12, 1.0, %v1269_v28  ;;  %vm437_vm6 = vcmp.gt.f32.partialorder %v429_v37, %v389_v29 }
 0x1c0   :  { %v395_v61 = vpop.xlane.xlu0 %394  ;;  %v716_v20 = vsel %vm2699_vm15, %v2089_v2, -inf  ;;  %vm2701_vm7 = vmand %vm2700_vm1, %vm1789_vm13  ;;  %vm2710_vm1 = vnez %v2626_v13  ;;  %v457_v9 = vsub.f32 0.5, %v1877_v32  ;;  %v637_v13 = vsel %vm2726_vm14, %v1063_v60, 0.0 }
 0x1c1   :  { %732 = vmax.xlane.f32.xlu0 %v731_v25  ;;  %vm439_vm5 = vcmp.gt.f32.partialorder %v431_v40, %v395_v61  ;;  %vm2704_vm10 = vmmov %vm2699_vm15 }
 0x1c2   :  { %487 = vmax.xlane.f32.xlu1 %v486_v26  ;;  %v477_v46 = vsel %vm2704_vm10, %v2108_v39, -inf  ;;  %vm2705_vm11 = vmmov %vm2704_vm10  ;;  %v465_v61 = vmul.f32 2.0, %v457_v9 }
 0x1c3   :  { %v876_v47 = vsel %vm2705_vm11, %v1079_v3, 0.0  ;;  %vm2706_vm15 = vmand %vm1847_vm0, %vm1789_vm13 }
 0x1c4   :  { %717 = vmax.xlane.f32.xlu2 %v716_v20  ;;  %v357_v8 = vpop.xlane.xlu1 %356  ;;  %vm2132_vm12 = vmand %vm2706_vm15, %vm437_vm6  ;;  %vm2717_vm15 = vnez %v2629_v58  ;;  %v463_v58 = vmul.f32 2.0, %v455_v1 }
 0x1c5   :  { %vm413_vm8 = vcmp.lt.f32.partialorder %v1057_v16, %v357_v8  ;;  %vm2714_vm13 = vmmov %vm2705_vm11  ;;  %v704_v16 = vmul.f32 50.0, %v1077_v62 }
 0x1c6   :  { %vm2120_vm4 = vmand %vm2701_vm7, %vm413_vm8  ;;  %vm2709_vm8 = vnez %v2635_v21  ;;  %v363_v7 = vpop.xlane.xlu2 %362  ;;  %v2155_v21 = vsel %vm2132_vm12, %v700_v48, -inf }
 0x1c7   :  { %v2138_v53 = vsel %vm2120_vm4, %v461_v4, -inf  ;;  %vm2711_vm7 = vmand %vm2709_vm8, %vm2710_vm1  ;;  %vm415_vm0 = vcmp.lt.f32.partialorder %v1059_v24, %v363_v7  ;;  %v1065_v8 = vsel %vm2120_vm4, 1.0, %v1269_v28 }
 0x1c8   :  { %vm2145_vm10 = vmand %vm2711_vm7, %vm439_vm5  ;;  %v483_v12 = vsel %vm2714_vm13, %v2138_v53, -inf  ;;  %v369_v54 = vpop.xlane.xlu0 %368 }
 0x1c9   :  { %478 = vmax.xlane.f32.xlu0 %v477_v46  ;;  %v2713_v18 = vsel %vm2145_vm10, 4294967295, %v2712_v18  ;;  %v2159_v55 = vsel %vm2145_vm10, %v702_v52, -inf  ;;  %vm417_vm6 = vcmp.lt.f32.partialorder %v1061_v49, %v369_v54  ;;  %vm2715_vm5 = vmmov %vm2705_vm11  ;;  %vm2721_vm10 = vnez %v2645_v6 }
 0x1ca   :  { %877 = vadd.xlane.f32.xlu1 %v876_v47  ;;  %v722_v10 = vsel %vm2715_vm5, %v2155_v21, -inf  ;;  %vm2716_vm11 = vmmov %vm2715_vm5  ;;  %vm2722_vm5 = vnez %v2639_v63  ;;  %v1081_v46 = vsel %vm2132_vm12, 1.0, %v1269_v28 }
 0x1cb   :  { %v728_v25 = vsel %vm2716_vm11, %v2159_v55, -inf  ;;  %vm2718_vm8 = vmand %vm2717_vm15, %vm2710_vm1  ;;  %vm2727_vm1 = vnez %v2642_v31 }
 0x1cc   :  { %484 = vmax.xlane.f32.xlu2 %v483_v12  ;;  %v401_v0 = vpop.xlane.xlu1 %400  ;;  %vm2176_vm7 = vmand %vm2718_vm8, %vm415_vm0  ;;  %vm2734_vm8 = vnez %v2666_v23 }
 0x1cd   :  { %vm441_vm13 = vcmp.gt.f32.partialorder %v433_v57, %v401_v0  ;;  %vm2723_vm3 = vmand %vm2721_vm10, %vm2722_vm5  ;;  %v2202_v6 = vsel %vm2176_vm7, %v463_v58, -inf  ;;  %v1064_v40 = vsel %vm2734_vm8, 1.0, %v1269_v28 }
 0x1ce   :  { %vm2186_vm11 = vmand %vm2723_vm3, %vm417_vm6  ;;  %v489_v63 = vsel %vm2726_vm14, %v2202_v6, -inf  ;;  %vm2733_vm6 = vnez %v2661_v11 }
 0x1cf   :  { %vm2728_vm0 = vmand %vm2727_vm1, %vm2722_vm5  ;;  %v2206_v20 = vsel %vm2186_vm11, %v465_v61, -inf  ;;  %v1080_v37 = vsel %vm2733_vm6, 1.0, %v1269_v28 }
 0x1d0   :  { %vm2196_vm15 = vmand %vm2728_vm0, %vm441_vm13 }
 0x1d1   :  { %723 = vmax.xlane.f32.xlu0 %v722_v10  ;;  %v2210_v34 = vsel %vm2196_vm15, %v704_v16, -inf  ;;  %vm2731_vm3 = vmmov %vm2726_vm14  ;;  %v1085_v50 = vsel %vm2196_vm15, 1.0, %v1269_v28 }
 0x1d2   :  { %729 = vmax.xlane.f32.xlu1 %v728_v25  ;;  %v495_v31 = vsel %vm2731_vm3, %v2206_v20, -inf  ;;  %vm2732_vm10 = vmmov %vm2731_vm3 }
 0x1d3   :  { %v734_v35 = vsel %vm2732_vm10, %v2210_v34, -inf  ;;  %vm2735_vm13 = vmmov %vm2731_vm3 }
 0x1d4   :  { %638 = vadd.xlane.f32.xlu2 %v637_v13  ;;  %v879_v3 = vsel %vm2735_vm13, %v1080_v37, 0.0  ;;  %vm2736_vm5 = vmmov %vm2731_vm3  ;;  %vm2742_vm13 = vnez %v2655_v14 }
 0x1d5   :  { %v643_v4 = vsel %vm2736_vm5, %v1065_v8, 0.0  ;;  %vm2737_vm1 = vmmov %vm2731_vm3  ;;  %vm2740_vm3 = vnez %v2651_v51 }
 0x1d6   :  { %v640_v42 = vsel %vm2737_vm1, %v1064_v40, 0.0  ;;  %vm2738_vm0 = vmmov %vm2737_vm1 }
 0x1d7   :  { %v646_v47 = vsel %vm2738_vm0, %v1066_v43, 0.0  ;;  %vm2739_vm14 = vmmov %vm2738_vm0 }
 0x1d8   :  { %v882_v12 = vsel %vm2739_vm14, %v1081_v46, 0.0  ;;  %vm2741_vm10 = vmmov %vm2738_vm0 }
 0x1d9   :  { %490 = vmax.xlane.f32.xlu0 %v489_v63  ;;  %vm2743_vm5 = vmmov %vm2738_vm0 }
 0x1da   :  { %496 = vmax.xlane.f32.xlu1 %v495_v31  ;;  %vm2744_vm1 = vmmov %vm2738_vm0  ;;  %vm2745_vm0 = vnez %v2671_v19  ;;  %v1068_v19 = vsel %vm2032_vm2, 1.0, %v1269_v28 }
 0x1db   :  { %vm2746_vm14 = vmmov %vm2744_vm1 }
 0x1dc   :  { %735 = vmax.xlane.f32.xlu2 %v734_v35 }
 0x1e1   :  { %880 = vadd.xlane.f32.xlu0 %v879_v3 }
 0x1e2   :  { %644 = vadd.xlane.f32.xlu1 %v643_v4 }
 0x1e4   :  { %641 = vadd.xlane.f32.xlu2 %v640_v42 }
 0x1e9   :  { %647 = vadd.xlane.f32.xlu0 %v646_v47 }
 0x1ec   :  { %883 = vadd.xlane.f32.xlu2 %v882_v12 }
 0x21c   :  { %v715_v7 = vpop.xlane.xlu1 %714 }
 0x21d   :  { %v2238_v48 = vmax.f32 %v715_v7, 0.0 }
 0x21f   :  { %v476_v52 = vpop.xlane.xlu2 %475  ;;  %v745_v24 = vsub.f32 %v1946_v22, %v2238_v48 }
 0x220   :  { %v2240_v54 = vmax.f32 %v476_v52, 0.0 }
 0x221   :  { %v753_v57 = vmul.f32 1.442695, %v745_v24 }
 0x222   :  { %v506_v49 = vsub.f32 %v1962_v56, %v2240_v54 }
 0x223   :  { %1151 = vpow2.f32 %v753_v57 }
 0x224   :  { %v514_v0 = vmul.f32 1.442695, %v506_v49  ;;  %v482_v60 = vpop.xlane.xlu0 %481 }
 0x225   :  { %v721_v1 = vpop.xlane.xlu1 %720  ;;  %v2246_v9 = vmax.f32 %v482_v60, 0.0 }
 0x226   :  { %1153 = vpow2.f32 %v514_v0  ;;  %v2248_v10 = vmax.f32 %v721_v1, 0.0 }
 0x227   :  { %v727_v25 = vpop.xlane.xlu2 %726  ;;  %v508_v62 = vsub.f32 %v1994_v15, %v2246_v9 }
 0x228   :  { %v2252_v13 = vmax.f32 %v727_v25, 0.0  ;;  %v747_v22 = vsub.f32 %v1981_v27, %v2248_v10 }
 0x229   :  { %v1152_v56 = vpop.eup %1151  ;;  %v518_v58 = vmul.f32 1.442695, %v508_v62 }
 0x22a   :  { %v749_v61 = vsub.f32 %v2011_v33, %v2252_v13  ;;  %v769_v16 = vsel %vm2740_vm3, %v1152_v56, 0.0  ;;  %v757_v35 = vmul.f32 1.442695, %v747_v22  ;;  %vm2749_vm3 = vnez %v2687_v30 }
 0x22b   :  { %1155 = vpow2.f32 %v518_v58  ;;  %v777_v37 = vsel %vm2741_vm10, %v769_v16, 0.0  ;;  %vm2750_vm10 = vmmov %vm2744_vm1  ;;  %v1084_v26 = vsel %vm2749_vm3, 1.0, %v1269_v28  ;;  %v801_v30 = vsub.f32 0.0, %v2238_v48 }
 0x22c   :  { %v1154_v63 = vpop.eup %1153  ;;  %v761_v31 = vmul.f32 1.442695, %v749_v61  ;;  %v2261_v15 = vpop.xlane.xlu0 %874  ;;  %778 = vadd.xlane.f32.xlu2 %v777_v37 }
 0x22d   :  { %v530_v8 = vsel %vm2742_vm13, %v1154_v63, 0.0  ;;  %v2265_v27 = vpop.xlane.xlu1 %635  ;;  %vm2751_vm13 = vnez %v2692_v17 }
 0x22e   :  { %1157 = vpow2.f32 %v761_v31  ;;  %v538_v33 = vsel %vm2743_vm5, %v530_v8, 0.0  ;;  %vm2752_vm5 = vmmov %vm2744_vm1 }
 0x22f   :  { %539 = vadd.xlane.f32.xlu0 %v538_v33  ;;  %v494_v51 = vpop.xlane.xlu2 %493  ;;  %1159 = vpow2.f32 %v757_v35 }
 0x230   :  { %v2268_v40 = vmax.f32 %v494_v51, 0.0 }
 0x231   :  { %v1156_v3 = vpop.eup %1155 }
 0x232   :  { %v512_v4 = vsub.f32 %v2049_v41, %v2268_v40  ;;  %v532_v42 = vsel %vm2734_vm8, %v1156_v3, 0.0  ;;  %vm2747_vm8 = vmmov %vm2744_vm1 }
 0x233   :  { %v544_v46 = vsel %vm2744_vm1, %v532_v42, 0.0 }
 0x234   :  { %v1158_v14 = vpop.eup %1157  ;;  %v526_v43 = vmul.f32 1.442695, %v512_v4  ;;  %v733_v47 = vpop.xlane.xlu0 %732  ;;  %545 = vadd.xlane.f32.xlu1 %v544_v46 }
 0x235   :  { %v773_v12 = vsel %vm2745_vm0, %v1158_v14, 0.0  ;;  %v488_v7 = vpop.xlane.xlu1 %487  ;;  %v1160_v52 = vpop.eup %1159  ;;  %v2277_v24 = vmax.f32 %v733_v47, 0.0 }
 0x236   :  { %1161 = vpow2.f32 %v526_v43  ;;  %v789_v49 = vsel %vm2746_vm14, %v773_v12, 0.0  ;;  %v2280_v41 = vmax.f32 %v488_v7, 0.0  ;;  %v771_v57 = vsel %vm2733_vm6, %v1160_v52, 0.0  ;;  %vm2748_vm6 = vmmov %vm2744_vm1 }
 0x237   :  { %790 = vadd.xlane.f32.xlu0 %v789_v49  ;;  %v718_v23 = vpop.xlane.xlu2 %717  ;;  %v751_v0 = vsub.f32 %v2067_v45, %v2277_v24  ;;  %v783_v1 = vsel %vm2747_vm8, %v771_v57, 0.0  ;;  %vm2753_vm14 = vnez %v2698_v44  ;;  %vm2754_vm8 = vmmov %vm2744_vm1 }
 0x238   :  { %v2286_v60 = vmax.f32 %v718_v23, 0.0  ;;  %784 = vadd.xlane.f32.xlu2 %v783_v1  ;;  %v510_v25 = vsub.f32 %v2071_v5, %v2280_v41 }
 0x239   :  { %v765_v62 = vmul.f32 1.442695, %v751_v0 }
 0x23a   :  { %v746_v22 = vsub.f32 %v2089_v2, %v2286_v60  ;;  %v522_v11 = vmul.f32 1.442695, %v510_v25 }
 0x23b   :  { %1163 = vpow2.f32 %v765_v62 }
 0x23c   :  { %v1162_v56 = vpop.eup %1161  ;;  %v755_v58 = vmul.f32 1.442695, %v746_v22  ;;  %v479_v61 = vpop.xlane.xlu0 %478 }
 0x23d   :  { %v536_v45 = vsel %vm2032_vm2, %v1162_v56, 0.0  ;;  %v2295_v16 = vpop.xlane.xlu1 %877  ;;  %v2297_v63 = vmax.f32 %v479_v61, 0.0 }
 0x23e   :  { %1165 = vpow2.f32 %v755_v58  ;;  %v556_v31 = vsel %vm2748_vm6, %v536_v45, 0.0  ;;  %vm2757_vm6 = vnez %v2713_v18  ;;  %v1069_v18 = vsel %vm2186_vm11, 1.0, %v1269_v28 }
 0x23f   :  { %557 = vadd.xlane.f32.xlu0 %v556_v31  ;;  %v485_v5 = vpop.xlane.xlu2 %484  ;;  %1167 = vpow2.f32 %v522_v11  ;;  %v507_v2 = vsub.f32 %v2108_v39, %v2297_v63 }
 0x240   :  { %v2302_v35 = vmax.f32 %v485_v5, 0.0 }
 0x241   :  { %v1164_v37 = vpop.eup %1163  ;;  %v516_v8 = vmul.f32 1.442695, %v507_v2 }
 0x242   :  { %v509_v33 = vsub.f32 %v2138_v53, %v2302_v35  ;;  %v775_v51 = vsel %vm2749_vm3, %v1164_v37, 0.0  ;;  %vm897_vm3 = vcmp.gt.f32.partialorder %v2261_v15, 0.0 }
 0x243   :  { %1169 = vpow2.f32 %v516_v8  ;;  %v795_v42 = vsel %vm2750_vm10, %v775_v51, 0.0  ;;  %vm2758_vm10 = vmmov %vm2744_vm1 }
 0x244   :  { %v1166_v3 = vpop.eup %1165  ;;  %v520_v4 = vmul.f32 1.442695, %v509_v33  ;;  %v724_v14 = vpop.xlane.xlu0 %723  ;;  %796 = vadd.xlane.f32.xlu1 %v795_v42 }
 0x245   :  { %v770_v43 = vsel %vm2751_vm13, %v1166_v3, 0.0  ;;  %v730_v39 = vpop.xlane.xlu1 %729  ;;  %v1168_v46 = vpop.eup %1167  ;;  %v2311_v47 = vmax.f32 %v724_v14, 0.0  ;;  %vm2760_vm13 = vmmov %vm2744_vm1 }
 0x246   :  { %1171 = vpow2.f32 %v520_v4  ;;  %v780_v53 = vsel %vm2752_vm5, %v770_v43, 0.0  ;;  %v2314_v12 = vmax.f32 %v730_v39, 0.0  ;;  %v534_v52 = vsel %vm2043_vm9, %v1168_v46, 0.0  ;;  %vm2755_vm9 = vmmov %vm2744_vm1 }
 0x247   :  { %781 = vadd.xlane.f32.xlu0 %v780_v53  ;;  %v2316_v7 = vpop.xlane.xlu2 %638  ;;  %v748_v17 = vsub.f32 %v2155_v21, %v2311_v47  ;;  %v550_v49 = vsel %vm2744_vm1, %v534_v52, 0.0  ;;  %vm2761_vm5 = vmmov %vm2744_vm1  ;;  %v1082_v52 = vsel %vm2745_vm0, 1.0, %v1269_v28 }
 0x248   :  { %551 = vadd.xlane.f32.xlu2 %v550_v49  ;;  %v750_v23 = vsub.f32 %v2159_v55, %v2314_v12  ;;  %v885_v49 = vsel %vm2744_vm1, %v1082_v52, 0.0  ;;  %vm2764_vm0 = vmmov %vm2744_vm1 }
 0x249   :  { %v1170_v57 = vpop.eup %1169  ;;  %v759_v0 = vmul.f32 1.442695, %v748_v17  ;;  %v1083_v17 = vsel %vm2757_vm6, 1.0, %v1269_v28  ;;  %vm2767_vm2 = vmmov %vm2764_vm0 }
 0x24a   :  { %v763_v1 = vmul.f32 1.442695, %v750_v23  ;;  %v531_v25 = vsel %vm2753_vm14, %v1170_v57, 0.0  ;;  %v1067_v23 = vsel %vm2176_vm7, 1.0, %v1269_v28  ;;  %vm2762_vm14 = vmmov %vm2744_vm1  ;;  %v894_v29 = vsel %vm2767_vm2, %v1085_v50, 0.0 }
 0x24b   :  { %1173 = vpow2.f32 %v759_v0  ;;  %v541_v38 = vsel %vm2754_vm8, %v531_v25, 0.0  ;;  %v888_v57 = vsel %vm2762_vm14, %v1083_v17, 0.0  ;;  %vm2763_vm8 = vmmov %vm2744_vm1 }
 0x24c   :  { %v1172_v62 = vpop.eup %1171  ;;  %v491_v22 = vpop.xlane.xlu0 %490  ;;  %542 = vadd.xlane.f32.xlu1 %v541_v38  ;;  %1175 = vpow2.f32 %v763_v1  ;;  %v649_v0 = vsel %vm2763_vm8, %v1067_v23, 0.0  ;;  %v652_v1 = vsel %vm2764_vm0, %v1068_v19, 0.0 }
 0x24d   :  { %v533_v21 = vsel %vm2120_vm4, %v1172_v62, 0.0  ;;  %v497_v56 = vpop.xlane.xlu1 %496  ;;  %v2330_v58 = vmax.f32 %v491_v22, 0.0  ;;  %vm2756_vm4 = vmmov %vm2744_vm1 }
 0x24e   :  { %v547_v55 = vsel %vm2755_vm9, %v533_v21, 0.0  ;;  %v2333_v11 = vmax.f32 %v497_v56, 0.0  ;;  %vm2766_vm9 = vmmov %vm2764_vm0  ;;  %v1270_v21 = vmov 50.0   ;;  %v562_v56 = vsub.f32 0.0, %v2240_v54 }
 0x24f   :  { %548 = vadd.xlane.f32.xlu0 %v547_v55  ;;  %v736_v44 = vpop.xlane.xlu2 %735  ;;  %v511_v61 = vsub.f32 %v2202_v6, %v2330_v58  ;;  %v891_v62 = vsel %vm2766_vm9, %v1084_v26, 0.0  ;;  %v1271_v55 = vmov 2.0  }
 0x250   :  { %v2337_v45 = vmax.f32 %v736_v44, 0.0  ;;  %v513_v31 = vsub.f32 %v2206_v20, %v2333_v11  ;;  %v809_v44 = vmul.f32 1.442695, %v801_v30  ;;  %v566_v30 = vsub.f32 0.0, %v2280_v41 }
 0x251   :  { %v1174_v36 = vpop.eup %1173  ;;  %v524_v5 = vmul.f32 1.442695, %v511_v61 }
 0x252   :  { %v752_v2 = vsub.f32 %v2210_v34, %v2337_v45  ;;  %v772_v37 = vsel %vm2132_vm12, %v1174_v36, 0.0  ;;  %v1176_v8 = vpop.eup %1175  ;;  %v528_v51 = vmul.f32 1.442695, %v513_v31  ;;  %vm2759_vm12 = vmmov %vm2744_vm1  ;;  %v570_v31 = vmul.f32 1.442695, %v562_v56 }
 0x253   :  { %1177 = vpow2.f32 %v524_v5  ;;  %v786_v3 = vsel %vm2756_vm4, %v772_v37, 0.0  ;;  %v774_v6 = vsel %vm2757_vm6, %v1176_v8, 0.0  ;;  %vm658_vm4 = vcmp.gt.f32.partialorder %v2265_v27, 0.0 }
 0x254   :  { %v767_v33 = vmul.f32 1.442695, %v752_v2  ;;  %787 = vadd.xlane.f32.xlu1 %v786_v3  ;;  %v792_v20 = vsel %vm2758_vm10, %v774_v6, 0.0  ;;  %v2388_v22 = vpop.xlane.xlu0 %880  ;;  %v578_v15 = vmul.f32 1.442695, %v566_v30  ;;  %v807_v27 = vsub.f32 0.0, %v2277_v24 }
 0x255   :  { %793 = vadd.xlane.f32.xlu2 %v792_v20  ;;  %vm899_vm6 = vcmp.gt.f32.partialorder %v2388_v22, 0.0  ;;  %vm952_vm1 = vcmask 7168  }
 0x256   :  { %1179 = vpow2.f32 %v767_v33 }
 0x257   :  { %1181 = vpow2.f32 %v528_v51  ;;  %v2386_v38 = vpop.xlane.xlu2 %641 }
 0x258   :  { %1183 = vrcp.f32 %v1270_v21  ;;  %vm660_vm10 = vcmp.gt.f32.partialorder %v2386_v38, 0.0 }
 0x259   :  { %v1178_v4 = vpop.eup %1177  ;;  %1185 = vrcp.f32 %v1271_v55 }
 0x25a   :  { %v535_v59 = vsel %vm2176_vm7, %v1178_v4, 0.0  ;;  %vm2765_vm7 = vmmov %vm2764_vm0  ;;  %1187 = vpow2.f32 %v809_v44  ;;  %v564_v4 = vsub.f32 0.0, %v2246_v9 }
 0x25b   :  { %v553_v42 = vsel %vm2759_vm12, %v535_v59, 0.0  ;;  %v655_v25 = vsel %vm2765_vm7, %v1069_v18, 0.0  ;;  %1189 = vpow2.f32 %v570_v31  ;;  %v802_v18 = vsub.f32 0.0, %v2286_v60 }
 0x25c   :  { %v1180_v34 = vpop.eup %1179  ;;  %554 = vadd.xlane.f32.xlu1 %v553_v42  ;;  %v2394_v5 = vpop.xlane.xlu0 %647 }
 0x25d   :  { %v776_v14 = vsel %vm2196_vm15, %v1180_v34, 0.0  ;;  %v1182_v43 = vpop.eup %1181  ;;  %v803_v34 = vsub.f32 0.0, %v2248_v10  ;;  %v811_v55 = vmul.f32 1.442695, %v802_v18  ;;  %vm662_vm7 = vcmp.gt.f32.partialorder %v2394_v5, 0.0 }
 0x25e   :  { %v798_v39 = vsel %vm2760_vm13, %v776_v14, 0.0  ;;  %v537_v46 = vsel %vm2186_vm11, %v1182_v43, 0.0  ;;  %v1184_v61 = vpop.eup %1183  ;;  %vm898_vm13 = vcmp.gt.f32.partialorder %v2295_v16, 0.0 }
 0x25f   :  { %799 = vadd.xlane.f32.xlu0 %v798_v39  ;;  %v559_v53 = vsel %vm2761_vm5, %v537_v46, 0.0  ;;  %v2392_v32 = vpop.xlane.xlu2 %883  ;;  %v1186_v36 = vpop.eup %1185  ;;  %v906_v2 = vmul.f32 50.0, %v1184_v61  ;;  %v574_v39 = vmul.f32 1.442695, %v564_v4  ;;  %vm910_vm11 = vweird.f32 %v1184_v61 }
 0x260   :  { %560 = vadd.xlane.f32.xlu2 %v559_v53  ;;  %v667_v37 = vmul.f32 2.0, %v1186_v36  ;;  %v1188_v33 = vpop.eup %1187  ;;  %v2398_v46 = vpop.xlane.xlu1 %644  ;;  %v813_v53 = vmul.f32 1.442695, %v803_v34  ;;  %vm671_vm15 = vweird.f32 %v1186_v36  ;;  %vm659_vm5 = vcmp.gt.f32.partialorder %v2316_v7, 0.0 }
 0x261   :  { %v907_v8 = vsub.f32 1.0, %v906_v2  ;;  %v1190_v20 = vpop.eup %1189  ;;  %vm661_vm14 = vcmp.gt.f32.partialorder %v2398_v46, 0.0  ;;  %vm900_vm9 = vcmp.gt.f32.partialorder %v2392_v32, 0.0 }
 0x262   :  { %v668_v3 = vsub.f32 1.0, %v667_v37 }
 0x263   :  { %v908_v14 = vmul.f32 %v1184_v61, %v907_v8 }
 0x264   :  { %886 = vadd.xlane.f32.xlu1 %v885_v49  ;;  %v669_v43 = vmul.f32 %v1186_v36, %v668_v3 }
 0x265   :  { %v909_v52 = vadd.f32 %v1184_v61, %v908_v14 }
 0x266   :  { %v670_v49 = vadd.f32 %v1186_v36, %v669_v43 }
 0x267   :  { %889 = vadd.xlane.f32.xlu0 %v888_v57  ;;  %v2402_v19 = vsel %vm910_vm11, %v1184_v61, %v909_v52  ;;  %v821_v52 = vmul.f32 1.442695, %v807_v27 }
 0x268   :  { %650 = vadd.xlane.f32.xlu2 %v649_v0 }
 0x26c   :  { %653 = vadd.xlane.f32.xlu1 %v652_v1 }
 0x26f   :  { %656 = vadd.xlane.f32.xlu0 %v655_v25  ;;  %v2406_v25 = vsel %vm671_vm15, %v1186_v36, %v670_v49 }
 0x270   :  { %892 = vadd.xlane.f32.xlu2 %v891_v62 }
 0x274   :  { %895 = vadd.xlane.f32.xlu1 %v894_v29 }
 0x29f   :  { %v779_v51 = vpop.xlane.xlu2 %778 }
 0x2a0   :  { %v825_v6 = vadd.f32 %v1188_v33, %v779_v51  ;;  %v565_v51 = vsub.f32 0.0, %v2302_v35 }
 0x2a2   :  { %v540_v59 = vpop.xlane.xlu0 %539  ;;  %1191 = vlog2.f32 %v825_v6  ;;  %v568_v6 = vsub.f32 0.0, %v2268_v40  ;;  %v576_v4 = vmul.f32 1.442695, %v565_v51 }
 0x2a3   :  { %v586_v42 = vadd.f32 %v1190_v20, %v540_v59  ;;  %v804_v59 = vsub.f32 0.0, %v2311_v47 }
 0x2a4   :  { %v582_v43 = vmul.f32 1.442695, %v568_v6 }
 0x2a5   :  { %1193 = vlog2.f32 %v586_v42  ;;  %v806_v42 = vsub.f32 0.0, %v2314_v12 }
 0x2a6   :  { %1195 = vpow2.f32 %v574_v39 }
 0x2a7   :  { %1197 = vpow2.f32 %v813_v53  ;;  %v546_v29 = vpop.xlane.xlu1 %545 }
 0x2a8   :  { %v1192_v17 = vpop.eup %1191  ;;  %1199 = vpow2.f32 %v811_v55 }
 0x2a9   :  { %v834_v23 = vmul.f32 0.6931472, %v1192_v17 }
 0x2aa   :  { %v2400_v57 = vpop.xlane.xlu0 %790 }
 0x2ab   :  { %v1194_v0 = vpop.eup %1193  ;;  %v849_v26 = vadd.f32 %v834_v23, %v2238_v48  ;;  %v785_v21 = vpop.xlane.xlu2 %784  ;;  %v805_v48 = vsub.f32 0.0, %v2252_v13  ;;  %v815_v23 = vmul.f32 1.442695, %v804_v59 }
 0x2ac   :  { %v595_v1 = vmul.f32 0.6931472, %v1194_v0  ;;  %v1196_v56 = vpop.eup %1195 }
 0x2ad   :  { %v912_v50 = vmul.f32 %v2402_v19, %v849_v26  ;;  %v1198_v31 = vpop.eup %1197  ;;  %v588_v36 = vadd.f32 %v1196_v56, %v546_v29  ;;  %v817_v3 = vmul.f32 1.442695, %v805_v48 }
 0x2ae   :  { %v610_v62 = vadd.f32 %v595_v1, %v2240_v54  ;;  %v563_v54 = vsub.f32 0.0, %v2297_v63  ;;  %v827_v37 = vadd.f32 %v1198_v31, %v785_v21  ;;  %v1200_v14 = vpop.eup %1199  ;;  %v819_v1 = vmul.f32 1.442695, %v806_v42 }
 0x2af   :  { %v920_v61 = vsel %vm897_vm3, %v912_v50, 0.0  ;;  %1201 = vlog2.f32 %v588_v36  ;;  %v567_v21 = vsub.f32 0.0, %v2330_v58 }
 0x2b0   :  { %v673_v44 = vmul.f32 %v2406_v25, %v610_v62  ;;  %v572_v20 = vmul.f32 1.442695, %v563_v54  ;;  %1203 = vlog2.f32 %v827_v37 }
 0x2b1   :  { %1205 = vpow2.f32 %v578_v15  ;;  %v580_v51 = vmul.f32 1.442695, %v567_v21 }
 0x2b2   :  { %v681_v2 = vsel %vm658_vm4, %v673_v44, 0.0  ;;  %v2416_v8 = vpop.xlane.xlu0 %557  ;;  %1207 = vpow2.f32 %v817_v3  ;;  %v808_v44 = vsub.f32 0.0, %v2337_v45  ;;  %v569_v3 = vsub.f32 0.0, %v2333_v11 }
 0x2b3   :  { %v2418_v33 = vadd.f32 %v920_v61, %v681_v2  ;;  %1209 = vpow2.f32 %v572_v20 }
 0x2b4   :  { %1211 = vpow2.f32 %v576_v4  ;;  %v823_v20 = vmul.f32 1.442695, %v808_v44 }
 0x2b5   :  { %v1202_v53 = vpop.eup %1201  ;;  %vm936_vm12 = vcmp.gt.f32.partialorder %v2418_v33, 0.0 }
 0x2b6   :  { %v1204_v49 = vpop.eup %1203  ;;  %v599_v26 = vmul.f32 0.6931472, %v1202_v53 }
 0x2b7   :  { %v2424_v34 = vpop.xlane.xlu1 %796  ;;  %v1206_v18 = vpop.eup %1205  ;;  %v838_v29 = vmul.f32 0.6931472, %v1204_v49 }
 0x2b8   :  { %v1208_v50 = vpop.eup %1207  ;;  %v612_v48 = vadd.f32 %v599_v26, %v2246_v9 }
 0x2b9   :  { %v1210_v30 = vpop.eup %1209  ;;  %v829_v56 = vadd.f32 %v1208_v50, %v2400_v57  ;;  %v851_v2 = vadd.f32 %v838_v29, %v2248_v10  ;;  %v584_v10 = vmul.f32 1.442695, %v569_v3 }
 0x2ba   :  { %v782_v39 = vpop.xlane.xlu0 %781  ;;  %v1212_v31 = vpop.eup %1211  ;;  %v675_v4 = vmul.f32 %v2406_v25, %v612_v48 }
 0x2bb   :  { %v826_v17 = vadd.f32 %v1200_v14, %v782_v39  ;;  %v552_v0 = vpop.xlane.xlu2 %551  ;;  %v914_v59 = vmul.f32 %v2402_v19, %v851_v2 }
 0x2bc   :  { %v590_v62 = vadd.f32 %v1206_v18, %v552_v0 }
 0x2bd   :  { %1213 = vlog2.f32 %v826_v17  ;;  %v683_v17 = vsel %vm660_vm10, %v675_v4, 0.0 }
 0x2be   :  { %1215 = vpow2.f32 %v582_v43 }
 0x2bf   :  { %1217 = vpow2.f32 %v821_v52  ;;  %v543_v55 = vpop.xlane.xlu1 %542 }
 0x2c0   :  { %1219 = vpow2.f32 %v815_v23  ;;  %v587_v61 = vadd.f32 %v1210_v30, %v543_v55 }
 0x2c1   :  { %1221 = vpow2.f32 %v819_v1  ;;  %v922_v1 = vsel %vm899_vm6, %v914_v59, 0.0 }
 0x2c2   :  { %1223 = vlog2.f32 %v590_v62  ;;  %v549_v36 = vpop.xlane.xlu0 %548  ;;  %v930_v30 = vadd.f32 %v922_v1, %v683_v17 }
 0x2c3   :  { %v1214_v54 = vpop.eup %1213  ;;  %v589_v37 = vadd.f32 %v1212_v31, %v549_v36  ;;  %1225 = vlog2.f32 %v587_v61 }
 0x2c4   :  { %v1216_v15 = vpop.eup %1215  ;;  %1227 = vlog2.f32 %v829_v56  ;;  %v836_v57 = vmul.f32 0.6931472, %v1214_v54  ;;  %vm938_vm8 = vcmp.gt.f32.partialorder %v930_v30, 0.0 }
 0x2c5   :  { %v1218_v6 = vpop.eup %1217  ;;  %1229 = vlog2.f32 %v589_v37  ;;  %v592_v49 = vadd.f32 %v1216_v15, %v2416_v8  ;;  %v1088_v1 = vsel %vm938_vm8, 1.0, %v1269_v28 }
 0x2c6   :  { %v1220_v27 = vpop.eup %1219  ;;  %1231 = vpow2.f32 %v580_v51  ;;  %v850_v14 = vadd.f32 %v836_v57, %v2286_v60  ;;  %v831_v22 = vadd.f32 %v1218_v6, %v2424_v34  ;;  %v944_v34 = vsel %vm936_vm12, %v2418_v33, 0.0 }
 0x2c7   :  { %v1222_v9 = vpop.eup %1221  ;;  %v788_v43 = vpop.xlane.xlu1 %787  ;;  %1233 = vpow2.f32 %v823_v20  ;;  %v953_v33 = vsel %vm952_vm1, %v944_v34, 0.0 }
 0x2c8   :  { %v1224_v42 = vpop.eup %1223  ;;  %v828_v53 = vadd.f32 %v1220_v27, %v788_v43  ;;  %v794_v0 = vpop.xlane.xlu2 %793  ;;  %v913_v62 = vmul.f32 %v2402_v19, %v850_v14 }
 0x2c9   :  { %v1226_v39 = vpop.eup %1225  ;;  %v603_v26 = vmul.f32 0.6931472, %v1224_v42  ;;  %v830_v60 = vadd.f32 %v1222_v9, %v794_v0 }
 0x2ca   :  { %v1228_v52 = vpop.eup %1227  ;;  %v597_v23 = vmul.f32 0.6931472, %v1226_v39  ;;  %1235 = vlog2.f32 %v828_v53  ;;  %v921_v55 = vsel %vm898_vm13, %v913_v62, 0.0 }
 0x2cb   :  { %v1230_v18 = vpop.eup %1229  ;;  %v842_v29 = vmul.f32 0.6931472, %v1228_v52  ;;  %1237 = vlog2.f32 %v830_v60  ;;  %v614_v16 = vadd.f32 %v603_v26, %v2280_v41  ;;  %v946_v52 = vsel %vm938_vm8, %v930_v30, 0.0 }
 0x2cc   :  { %v601_v50 = vmul.f32 0.6931472, %v1230_v18  ;;  %v611_v38 = vadd.f32 %v597_v23, %v2297_v63  ;;  %v1232_v8 = vpop.eup %1231  ;;  %1239 = vpow2.f32 %v584_v10  ;;  %v1086_v63 = vsel %vm936_vm12, 1.0, %v1269_v28 }
 0x2cd   :  { %v1234_v56 = vpop.eup %1233  ;;  %1241 = vlog2.f32 %v592_v49  ;;  %v853_v36 = vadd.f32 %v842_v29, %v2252_v13  ;;  %v993_v37 = vsel %vm952_vm1, %v1086_v63, 0.0  ;;  %v677_v7 = vmul.f32 %v2406_v25, %v614_v16 }
 0x2ce   :  { %v674_v21 = vmul.f32 %v2406_v25, %v611_v38  ;;  %1243 = vlog2.f32 %v831_v22  ;;  %v613_v44 = vadd.f32 %v601_v50, %v2302_v35  ;;  %v956_v63 = vsel %vm952_vm1, %v946_v52, 0.0 }
 0x2cf   :  { %v555_v31 = vpop.xlane.xlu1 %554  ;;  %v685_v50 = vsel %vm662_vm7, %v677_v7, 0.0  ;;  %v996_v16 = vsel %vm952_vm1, %v1088_v1, 0.0 }
 0x2d0   :  { %v682_v61 = vsel %vm659_vm5, %v674_v21, 0.0  ;;  %v1236_v48 = vpop.eup %1235  ;;  %v591_v2 = vadd.f32 %v1232_v8, %v555_v31  ;;  %v676_v57 = vmul.f32 %v2406_v25, %v613_v44 }
 0x2d1   :  { %v929_v54 = vadd.f32 %v921_v55, %v682_v61  ;;  %v840_v41 = vmul.f32 0.6931472, %v1236_v48  ;;  %v1238_v51 = vpop.eup %1237 }
 0x2d2   :  { %v800_v15 = vpop.xlane.xlu0 %799  ;;  %1245 = vlog2.f32 %v591_v2  ;;  %v1240_v3 = vpop.eup %1239  ;;  %v844_v42 = vmul.f32 0.6931472, %v1238_v51  ;;  %v684_v49 = vsel %vm661_vm14, %v676_v57, 0.0 }
 0x2d3   :  { %vm937_vm0 = vcmp.gt.f32.partialorder %v929_v54, 0.0  ;;  %v832_v35 = vadd.f32 %v1234_v56, %v800_v15  ;;  %v852_v20 = vadd.f32 %v840_v41, %v2311_v47  ;;  %v561_v27 = vpop.xlane.xlu2 %560  ;;  %v1242_v4 = vpop.eup %1241  ;;  %v916_v47 = vmul.f32 %v2402_v19, %v853_v36 }
 0x2d4   :  { %v945_v6 = vsel %vm937_vm0, %v929_v54, 0.0  ;;  %v1087_v13 = vsel %vm937_vm0, 1.0, %v1269_v28  ;;  %v593_v10 = vadd.f32 %v1240_v3, %v561_v27  ;;  %v1244_v14 = vpop.eup %1243  ;;  %v607_v17 = vmul.f32 0.6931472, %v1242_v4 }
 0x2d5   :  { %v954_v9 = vsel %vm952_vm1, %v945_v6, 0.0  ;;  %v994_v59 = vsel %vm952_vm1, %v1087_v13, 0.0  ;;  %v915_v43 = vmul.f32 %v2402_v19, %v852_v20  ;;  %1247 = vlog2.f32 %v832_v35 }
 0x2d6   :  { %v955_v39 = vadd.f32 %v954_v9, %v953_v33  ;;  %v995_v53 = vadd.f32 %v994_v59, %v993_v37  ;;  %1249 = vlog2.f32 %v593_v10  ;;  %v846_v26 = vmul.f32 0.6931472, %v1244_v14 }
 0x2d7   :  { %v923_v23 = vsel %vm900_vm9, %v915_v43, 0.0  ;;  %v887_v0 = vpop.xlane.xlu1 %886  ;;  %v854_v32 = vadd.f32 %v844_v42, %v2314_v12  ;;  %v616_v8 = vadd.f32 %v607_v17, %v2268_v40 }
 0x2d8   :  { %v1246_v18 = vpop.eup %1245  ;;  %v931_v60 = vadd.f32 %v923_v23, %v684_v49  ;;  %vm901_vm2 = vcmp.gt.f32.partialorder %v887_v0, 0.0  ;;  %v855_v5 = vadd.f32 %v846_v26, %v2277_v24  ;;  %v957_v36 = vadd.f32 %v956_v63, %v955_v39 }
 0x2d9   :  { %v605_v62 = vmul.f32 0.6931472, %v1246_v18  ;;  %v924_v38 = vsel %vm901_vm2, %v916_v47, 0.0  ;;  %v917_v55 = vmul.f32 %v2402_v19, %v854_v32  ;;  %v997_v24 = vadd.f32 %v996_v16, %v995_v53 }
 0x2da   :  { %v890_v22 = vpop.xlane.xlu0 %889  ;;  %vm939_vm11 = vcmp.gt.f32.partialorder %v931_v60, 0.0  ;;  %v932_v46 = vadd.f32 %v924_v38, %v685_v50  ;;  %v918_v51 = vmul.f32 %v2402_v19, %v855_v5  ;;  %v679_v35 = vmul.f32 %v2406_v25, %v616_v8 }
 0x2db   :  { %v1248_v29 = vpop.eup %1247  ;;  %v615_v21 = vadd.f32 %v605_v62, %v2330_v58  ;;  %v651_v30 = vpop.xlane.xlu2 %650  ;;  %v947_v56 = vsel %vm939_vm11, %v931_v60, 0.0  ;;  %vm902_vm15 = vcmp.gt.f32.partialorder %v890_v22, 0.0  ;;  %v1089_v12 = vsel %vm939_vm11, 1.0, %v1269_v28 }
 0x2dc   :  { %v1250_v34 = vpop.eup %1249  ;;  %vm940_vm3 = vcmp.gt.f32.partialorder %v932_v46, 0.0  ;;  %v848_v40 = vmul.f32 0.6931472, %v1248_v29  ;;  %vm663_vm4 = vcmp.gt.f32.partialorder %v651_v30, 0.0  ;;  %v958_v58 = vsel %vm952_vm1, %v947_v56, 0.0 }
 0x2dd   :  { %v678_v44 = vmul.f32 %v2406_v25, %v615_v21  ;;  %v609_v61 = vmul.f32 0.6931472, %v1250_v34  ;;  %v925_v31 = vsel %vm902_vm15, %v917_v55, 0.0  ;;  %v998_v2 = vsel %vm952_vm1, %v1089_v12, 0.0 }
 0x2de   :  { %v1090_v37 = vsel %vm940_vm3, 1.0, %v1269_v28  ;;  %v959_v41 = vadd.f32 %v958_v58, %v957_v36  ;;  %v948_v15 = vsel %vm940_vm3, %v932_v46, 0.0  ;;  %v856_v57 = vadd.f32 %v848_v40, %v2337_v45 }
 0x2df   :  { %v686_v48 = vsel %vm663_vm4, %v678_v44, 0.0  ;;  %v654_v54 = vpop.xlane.xlu1 %653  ;;  %v617_v7 = vadd.f32 %v609_v61, %v2333_v11  ;;  %v999_v6 = vadd.f32 %v998_v2, %v997_v24  ;;  %v1000_v27 = vsel %vm952_vm1, %v1090_v37, 0.0 }
 0x2e0   :  { %v933_v33 = vadd.f32 %v925_v31, %v686_v48  ;;  %vm664_vm6 = vcmp.gt.f32.partialorder %v654_v54, 0.0  ;;  %v960_v59 = vsel %vm952_vm1, %v948_v15, 0.0  ;;  %v919_v53 = vmul.f32 %v2402_v19, %v856_v57 }
 0x2e1   :  { %v687_v9 = vsel %vm664_vm6, %v679_v35, 0.0  ;;  %v680_v14 = vmul.f32 %v2406_v25, %v617_v7  ;;  %v1001_v43 = vadd.f32 %v1000_v27, %v999_v6  ;;  %v961_v39 = vadd.f32 %v960_v59, %v959_v41 }
 0x2e2   :  { %vm941_vm10 = vcmp.gt.f32.partialorder %v933_v33, 0.0  ;;  %v657_v3 = vpop.xlane.xlu0 %656 }
 0x2e3   :  { %v949_v13 = vsel %vm941_vm10, %v933_v33, 0.0  ;;  %v1091_v20 = vsel %vm941_vm10, 1.0, %v1269_v28  ;;  %v893_v4 = vpop.xlane.xlu2 %892  ;;  %vm665_vm13 = vcmp.gt.f32.partialorder %v657_v3, 0.0 }
 0x2e4   :  { %vm903_vm12 = vcmp.gt.f32.partialorder %v893_v4, 0.0  ;;  %v1002_v10 = vsel %vm952_vm1, %v1091_v20, 0.0  ;;  %v962_v11 = vsel %vm952_vm1, %v949_v13, 0.0  ;;  %v688_v52 = vsel %vm665_vm13, %v680_v14, 0.0 }
 0x2e5   :  { %v926_v42 = vsel %vm903_vm12, %v918_v51, 0.0  ;;  %v1003_v17 = vadd.f32 %v1002_v10, %v1001_v43  ;;  %v963_v18 = vadd.f32 %v962_v11, %v961_v39 }
 0x2e6   :  { %v934_v45 = vadd.f32 %v926_v42, %v687_v9 }
 0x2e7   :  { %v896_v47 = vpop.xlane.xlu1 %895 }
 0x2e8   :  { %vm942_vm5 = vcmp.gt.f32.partialorder %v934_v45, 0.0  ;;  %vm904_vm14 = vcmp.gt.f32.partialorder %v896_v47, 0.0 }
 0x2e9   :  { %v950_v49 = vsel %vm942_vm5, %v934_v45, 0.0  ;;  %v927_v23 = vsel %vm904_vm14, %v919_v53, 0.0  ;;  %v1092_v0 = vsel %vm942_vm5, 1.0, %v1269_v28 }
 0x2ea   :  { %v935_v1 = vadd.f32 %v927_v23, %v688_v52  ;;  %v1004_v26 = vsel %vm952_vm1, %v1092_v0, 0.0  ;;  %v964_v25 = vsel %vm952_vm1, %v950_v49, 0.0 }
 0x2eb   :  { %v1005_v32 = vadd.f32 %v1004_v26, %v1003_v17  ;;  %v965_v62 = vadd.f32 %v964_v25, %v963_v18 }
 0x2ec   :  { %vm943_vm8 = vcmp.gt.f32.partialorder %v935_v1, 0.0 }
 0x2ed   :  { %v1093_v60 = vsel %vm943_vm8, 1.0, %v1269_v28  ;;  %v951_v19 = vsel %vm943_vm8, %v935_v1, 0.0 }
 0x2ee   :  { %v1006_v22 = vsel %vm952_vm1, %v1093_v60, 0.0  ;;  %v966_v50 = vsel %vm952_vm1, %v951_v19, 0.0 }
 0x2ef   :  { %v1007_v38 = vadd.f32 %v1006_v22, %v1005_v32  ;;  %v967_v46 = vadd.f32 %v966_v50, %v965_v62 }
 0x2f1   :  { %1008 = vadd.xlane.f32.xlu0 %v1007_v38  ;;  %968 = vadd.xlane.f32.xlu2 %v967_v46 }
 0x364   :  { %v1009_v29 = vpop.xlane.xlu0 %1008  ;;  %v969_v8 = vpop.xlane.xlu2 %968 }
 0x365   :  { %v1010_v21 = vrot.slane %v1009_v29, 4  ;;  %v970_v30 = vrot.slane %v969_v8, 4 }
 0x367   :  { %v1011_v56 = vadd.f32 %v1010_v21, %v1009_v29  ;;  %v971_v34 = vadd.f32 %v970_v30, %v969_v8 }
 0x369   :  { %v1012_v63 = vrot.slane %v1011_v56, 2  ;;  %v972_v12 = vrot.slane %v971_v34, 2 }
 0x36b   :  { %v1013_v28 = vadd.f32 %v1012_v63, %v1011_v56  ;;  %v973_v16 = vadd.f32 %v972_v12, %v971_v34 }
 0x36d   :  { %v974_v5 = vrot.slane %v973_v16, 1  ;;  %v1014_v55 = vrot.slane %v1013_v28, 1 }
 0x36f   :  { %v975_v44 = vadd.f32 %v974_v5, %v973_v16  ;;  %v1015_v40 = vadd.f32 %v1014_v55, %v1013_v28 }
 0x371   :  { %1118 = vpush %v975_v44 }
 0x372   :  { %1120 = vpush %v1015_v40 }
 0x3a2   :  { %s1119_s1 = spop %1118 }
 0x3a3   :  { %s1121_s19 = spop %1120 }
 0x3a4   :  { %s1018_s21 = smax.f32 %s1272_s20, %s1121_s19  ;;  %p1017_p0 = scmp.gt.f32.partialorder %s1121_s19, 0.0 }
 0x3a5   :  { %v1019_v61 = vstv %s1018_s21 }
 0x3a6   :  { %1251 = vrcp.f32 %v1019_v61  ;;  %v1031_v36 = vand.u32 2147483648, %v1019_v61  ;;  %v1029_v2 = vand.u32 2147483647, %v1019_v61  ;;  %vm1025_vm0 = vweird.f32 %v1019_v61 }
 0x3a8   :  { %v1032_v37 = vor.u32 1.1754944e-38, %v1031_v36  ;;  %vm1030_vm9 = vcmp.eq.f32.partialorder %v1029_v2, 8.507059e+37 }
 0x3ac   :  { %v1252_v58 = vpop.eup %1251 }
 0x3ad   :  { %v1021_v31 = vmul.f32 %v1252_v58, %v1019_v61  ;;  %vm1026_vm1 = vweird.f32 %v1252_v58 }
 0x3ae   :  { %vm1027_vm7 = vmor %vm1025_vm0, %vm1026_vm1 }
 0x3af   :  { %v1022_v48 = vsub.f32 1.0, %v1021_v31 }
 0x3b1   :  { %v1023_v54 = vmul.f32 %v1252_v58, %v1022_v48 }
 0x3b3   :  { %v1024_v33 = vadd.f32 %v1252_v58, %v1023_v54 }
 0x3b5   :  { %v1028_v24 = vsel %vm1027_vm7, %v1252_v58, %v1024_v33 }
 0x3b6   :  { %v1033_v41 = vsel %vm1030_vm9, %v1032_v37, %v1028_v24 }
 0x3b7   :  { %1122 = vpush %v1033_v41 }
 0x3e8   :  { %s1123_s25 = spop %1122 }
 0x3e9   :  { %s1035_s26 = smul.f32 %s1123_s25, %s1119_s1 }
 0x3eb   :  { %s2769_s26 = smov (!%p1017_p0, %s1035_s26), 0.0 }
 0x3ec   :  { %1038 = sst [smem:[#allocation2]] %s2769_s26 }
 0x3ed   :  { %1047 = dma.smem_to_hbm %s1273_s27, 16, %s1045_s24, [#allocation3]  }
 0x3ee   :  { %1265 = dma.done.wait [#allocation3], 16  }
 0x3ef   :  { %1266 = vsyncadd [#allocation3], 4294967280 }
 0x3f0   :  { %1052 = sfence }
 0x3f1   :  { %1053 = vsyncpa [#allocation3], 1 }

</bundles_post_ra>
